<compile_context>
chip_gen: v7x
topology: tpu7x:2x2x1
jax: 0.10.0
libtpu: 0.0.40
codegen_flags: <defaults>
</compile_context>

<pallas_src>
from functools import partial

import jax
import jax.numpy as jnp
from jax.experimental import pallas as pl
from jax.experimental.pallas import tpu as pltpu


def _attention_kernel(x_ref, wqkv_ref, wproj_ref, bproj_ref, bias_ref, out_ref,
                      *, num_heads, scale):
    """One grid step == `batch_block` batch elements; everything on-chip.

    x_ref:     (Bb, N, C)  f32
    wqkv_ref:  (C, 3C)     bf16   fused QKV weight, lane-dense columns (3,H,hd)
    wproj_ref: (C, C)      bf16
    bproj_ref: (1, C)      f32
    bias_ref:  (N, N)      f32    additive mask (0 / -1e30), built on host
    out_ref:   (Bb, N, C)  f32
    """
    Bb, N, C = x_ref.shape
    H = num_heads
    hd = C // H
    BN = Bb * N

    # Fold batch into the token (sublane) axis: ONE lane-dense MXU pass for QKV.
    # N is a multiple of 8, so this f32->layout reshape is tile-aligned (cheap).
    x = x_ref[...].reshape(BN, C).astype(jnp.bfloat16)
    qkv = jnp.dot(x, wqkv_ref[...], preferred_element_type=jnp.float32)       # (BN, 3C) f32

    q = qkv[:, :C] * scale            # scale in f32 on (BN,C): exact & trivial VPU cost
    k = qkv[:, C:2 * C]
    v = qkv[:, 2 * C:]

    # Head split: static lane slices stacked on a new MAJOR axis, then the batch
    # index is pulled out of the sublane axis.  Group index g = h * Bb + b.
    def split_heads(t):               # (BN, C) f32 -> (H*Bb, N, hd) bf16
        th = jnp.stack([t[:, h * hd:(h + 1) * hd] for h in range(H)], axis=0)  # (H, BN, hd)
        return th.reshape(H * Bb, N, hd).astype(jnp.bfloat16)

    qh = split_heads(q)
    kh = split_heads(k)
    vh = split_heads(v)

    # Single masked score pass per (head, batch) group; mask precomputed on host.
    # TODO(synk): at production ViT sizes (N ~ 1k, H ~ 12) add a KV-block grid
    # axis with online softmax so (G, N, N) scores never live in VMEM (v7x 64 MiB).
    s = jnp.einsum('gnd,gmd->gnm', qh, kh, preferred_element_type=jnp.float32)  # (G,N,N) f32
    s = s + bias_ref[...][None]

    # Softmax with deferred normalization (all elementwise math in f32 for v5e).
    m = jnp.max(s, axis=-1, keepdims=True)
    p = jnp.exp(s - m)
    l = jnp.sum(p, axis=-1, keepdims=True)

    o = jnp.einsum('gnm,gmd->gnd', p.astype(jnp.bfloat16), vh,
                   preferred_element_type=jnp.float32)                        # (G, N, hd) f32
    o = o * pl.reciprocal(l, approx=True)                                     # EUP slot

    # Merge heads back into lanes ((h, d) head-major == PyTorch reshape order),
    # then ONE lane-dense proj matmul for the whole block.
    o = o.reshape(H, BN, hd)                                                  # tile-aligned
    oc = jnp.concatenate([o[h] for h in range(H)], axis=-1).astype(jnp.bfloat16)  # (BN, C)
    y = jnp.dot(oc, wproj_ref[...], preferred_element_type=jnp.float32)
    y = y + bproj_ref[...]

    # NOTE: at the toy width C=32 (<128 lanes) this store is lane-masked; at real
    # ViT widths (C >= 384) it is lane-dense with no code change needed.
    out_ref[...] = y.reshape(Bb, N, C).astype(out_ref.dtype)


def attention_pallas(x, w_qkv, w_proj, b_proj, *, num_heads, text_tokens,
                     image_tokens, batch_block=1):
    """x: (B, N, C) f32; w_qkv: (C, 3C); w_proj: (C, C); b_proj: (C,).

    batch_block is a per-generation tuning knob: keep grid >= 2 on v7x (two
    TensorCores, "parallel" semantics); on single-TC v5e/v6e prefer
    batch_block == B (grid == 1) to amortize the ~0.35 us per-grid-step cost.
    """
    B, N, C = x.shape
    assert C % num_heads == 0 and N == text_tokens + image_tokens
    assert N % 8 == 0, "token count must be a multiple of 8 sublanes"
    assert B % batch_block == 0
    hd = C // num_heads
    scale = hd ** -0.5
    T = text_tokens

    # Additive attention mask built ONCE on the host (kept resident in VMEM):
    # text rows (< T) may only see text cols (< T); image rows see everything.
    row = jnp.arange(N, dtype=jnp.int32)[:, None]
    col = jnp.arange(N, dtype=jnp.int32)[None, :]
    allowed = jnp.logical_or(row >= T, col < T)
    bias = jnp.where(allowed, 0.0, -1e30).astype(jnp.float32)                 # (N, N)

    wqkv = w_qkv.astype(jnp.bfloat16)                  # (C, 3C) fused, lane-dense
    wproj = w_proj.astype(jnp.bfloat16)                # (C, C)
    bp = b_proj.reshape(1, C).astype(jnp.float32)

    kernel = partial(_attention_kernel, num_heads=num_heads, scale=scale)

    return pl.pallas_call(
        kernel,
        out_shape=jax.ShapeDtypeStruct((B, N, C), jnp.float32),
        grid_spec=pltpu.PrefetchScalarGridSpec(
            num_scalar_prefetch=0,
            grid=(B // batch_block,),
            in_specs=[
                pl.BlockSpec((batch_block, N, C), lambda b: (b, 0, 0)),   # x tile
                pl.BlockSpec((C, 3 * C), lambda b: (0, 0)),               # fused W_qkv
                pl.BlockSpec((C, C), lambda b: (0, 0)),                   # W_proj
                pl.BlockSpec((1, C), lambda b: (0, 0)),                   # proj bias
                pl.BlockSpec((N, N), lambda b: (0, 0)),                   # attention mask
            ],
            out_specs=pl.BlockSpec((batch_block, N, C), lambda b: (b, 0, 0)),
        ),
        compiler_params=pltpu.CompilerParams(dimension_semantics=("parallel",)),
    )(x, wqkv, wproj, bp, bias)


def attention_reference(x, w_qkv, w_proj, b_proj, *, num_heads, text_tokens, image_tokens):
    """Pure-JAX f32 reference mirroring the PyTorch forward exactly."""
    B, N, C = x.shape
    hd = C // num_heads
    T, S = text_tokens, image_tokens
    scale = hd ** -0.5

    qkv = (x @ w_qkv).reshape(B, N, 3, num_heads, hd).transpose(2, 0, 3, 1, 4)
    q, k, v = qkv[0], qkv[1], qkv[2]                                   # (B, H, N, hd)

    q_mt, q_s = q[:, :, :T], q[:, :, T:]
    k_mt, v_mt = k[:, :, :T], v[:, :, :T]

    a_mt = jax.nn.softmax(jnp.einsum('bhtd,bhsd->bhts', q_mt, k_mt) * scale, axis=-1)
    x_mt = jnp.einsum('bhts,bhsd->bhtd', a_mt, v_mt).transpose(0, 2, 1, 3).reshape(B, T, C)

    a_s = jax.nn.softmax(jnp.einsum('bhsd,bhnd->bhsn', q_s, k) * scale, axis=-1)
    x_s = jnp.einsum('bhsn,bhnd->bhsd', a_s, v).transpose(0, 2, 1, 3).reshape(B, S, C)

    out = jnp.concatenate([x_mt, x_s], axis=1)
    return out @ w_proj + b_proj[None]


if __name__ == "__main__":
    # Small, module-consistent shapes.
    B = 4
    C = 32            # dim
    num_heads = 4     # head_dim = 8
    text_tokens = 8
    image_tokens = 24
    N = text_tokens + image_tokens

    key = jax.random.PRNGKey(0)
    kx, kq, kp, kb = jax.random.split(key, 4)

    x = jax.random.normal(kx, (B, N, C), dtype=jnp.float32)
    # Deterministic synthetic parameters (qkv_bias=False; proj has bias).
    w_qkv = jax.random.normal(kq, (C, 3 * C), dtype=jnp.float32) * 0.05
    w_proj = jax.random.normal(kp, (C, C), dtype=jnp.float32) * 0.05
    b_proj = jax.random.normal(kb, (C,), dtype=jnp.float32) * 0.01

    out = attention_pallas(
        x, w_qkv, w_proj, b_proj,
        num_heads=num_heads, text_tokens=text_tokens, image_tokens=image_tokens,
        batch_block=2,                      # grid = B//2 = 2 steps -> both v7x TCs busy
    )
    out = jax.block_until_ready(out)

    ref = attention_reference(
        x, w_qkv, w_proj, b_proj,
        num_heads=num_heads, text_tokens=text_tokens, image_tokens=image_tokens,
    )
    assert out.shape == (B, N, C)
    # bf16 MXU inputs (f32 accumulation) -> compare against the f32 reference
    # with a bf16-appropriate tolerance.
    assert jnp.allclose(out, ref, atol=1e-2, rtol=1e-2), "Pallas output mismatch vs reference"

    print("KERNEL_OK")
</pallas_src>

<mosaic_0001>
module attributes {stable_mosaic.version = 11 : i64} {
  func.func @_attention_kernel(%arg0: i32, %arg1: memref<2x32x32xf32, #tpu.memory_space<vmem>>, %arg2: memref<32x96xbf16, #tpu.memory_space<vmem>>, %arg3: memref<32x32xbf16, #tpu.memory_space<vmem>>, %arg4: memref<1x32xf32, #tpu.memory_space<vmem>>, %arg5: memref<32x32xf32, #tpu.memory_space<vmem>>, %arg6: memref<2x32x32xf32, #tpu.memory_space<vmem>>) attributes {dimension_semantics = [#tpu.dimension_semantics<parallel>], iteration_bounds = array<i64: 2>, scalar_prefetch = 0 : i64, scratch_operands = 0 : i64, tpu.core_type = #tpu.core_type<tc>, window_params = [{transform_indices = @transform_0, window_bounds = array<i64: 2, 32, 32>}, {pipeline_mode = #tpu.pipeline_mode<synchronous>, transform_indices = @transform_1, window_bounds = array<i64: 32, 96>}, {pipeline_mode = #tpu.pipeline_mode<synchronous>, transform_indices = @transform_2, window_bounds = array<i64: 32, 32>}, {pipeline_mode = #tpu.pipeline_mode<synchronous>, transform_indices = @transform_3, window_bounds = array<i64: 1, 32>}, {pipeline_mode = #tpu.pipeline_mode<synchronous>, transform_indices = @transform_4, window_bounds = array<i64: 32, 32>}, {transform_indices = @transform_5, window_bounds = array<i64: 2, 32, 32>}]} {
    %c0 = arith.constant 0 : index
    %c0_0 = arith.constant 0 : index
    %c0_1 = arith.constant 0 : index
    %0 = vector.load %arg1[%c0, %c0_0, %c0_1] : memref<2x32x32xf32, #tpu.memory_space<vmem>>, vector<2x32x32xf32>
    %1 = vector.shape_cast %0 : vector<2x32x32xf32> to vector<64x32xf32>
    %2 = arith.truncf %1 : vector<64x32xf32> to vector<64x32xbf16>
    %c0_2 = arith.constant 0 : index
    %c0_3 = arith.constant 0 : index
    %3 = vector.load %arg2[%c0_2, %c0_3] : memref<32x96xbf16, #tpu.memory_space<vmem>>, vector<32x96xbf16>
    %cst = arith.constant dense<0.000000e+00> : vector<64x96xf32>
    %4 = tpu.matmul %2, %3, %cst {dimension_numbers = #tpu.dot_dimension_numbers<[1], [0], [0], [1], [0, 0, 1, 1], [], []>} : vector<64x32xbf16>, vector<32x96xbf16>, vector<64x96xf32> -> vector<64x96xf32>
    %5 = vector.extract_strided_slice %4 {offsets = [0, 0], sizes = [64, 32], strides = [1, 1]} : vector<64x96xf32> to vector<64x32xf32>
    %cst_4 = arith.constant 0.353553385 : f32
    %6 = vector.broadcast %cst_4 : f32 to vector<64x32xf32>
    %7 = arith.mulf %5, %6 : vector<64x32xf32>
    %8 = vector.extract_strided_slice %4 {offsets = [0, 32], sizes = [64, 32], strides = [1, 1]} : vector<64x96xf32> to vector<64x32xf32>
    %9 = vector.extract_strided_slice %4 {offsets = [0, 64], sizes = [64, 32], strides = [1, 1]} : vector<64x96xf32> to vector<64x32xf32>
    %10 = vector.extract_strided_slice %7 {offsets = [0, 0], sizes = [64, 8], strides = [1, 1]} : vector<64x32xf32> to vector<64x8xf32>
    %11 = vector.extract_strided_slice %7 {offsets = [0, 8], sizes = [64, 8], strides = [1, 1]} : vector<64x32xf32> to vector<64x8xf32>
    %12 = vector.extract_strided_slice %7 {offsets = [0, 16], sizes = [64, 8], strides = [1, 1]} : vector<64x32xf32> to vector<64x8xf32>
    %13 = vector.extract_strided_slice %7 {offsets = [0, 24], sizes = [64, 8], strides = [1, 1]} : vector<64x32xf32> to vector<64x8xf32>
    %14 = vector.shape_cast %10 : vector<64x8xf32> to vector<1x64x8xf32>
    %15 = vector.shape_cast %11 : vector<64x8xf32> to vector<1x64x8xf32>
    %16 = vector.shape_cast %12 : vector<64x8xf32> to vector<1x64x8xf32>
    %17 = vector.shape_cast %13 : vector<64x8xf32> to vector<1x64x8xf32>
    %18 = tpu.concatenate %14, %15, %16, %17 in 0 : vector<1x64x8xf32>, vector<1x64x8xf32>, vector<1x64x8xf32>, vector<1x64x8xf32> -> vector<4x64x8xf32>
    %19 = vector.shape_cast %18 : vector<4x64x8xf32> to vector<8x32x8xf32>
    %20 = arith.truncf %19 : vector<8x32x8xf32> to vector<8x32x8xbf16>
    %21 = vector.extract_strided_slice %8 {offsets = [0, 0], sizes = [64, 8], strides = [1, 1]} : vector<64x32xf32> to vector<64x8xf32>
    %22 = vector.extract_strided_slice %8 {offsets = [0, 8], sizes = [64, 8], strides = [1, 1]} : vector<64x32xf32> to vector<64x8xf32>
    %23 = vector.extract_strided_slice %8 {offsets = [0, 16], sizes = [64, 8], strides = [1, 1]} : vector<64x32xf32> to vector<64x8xf32>
    %24 = vector.extract_strided_slice %8 {offsets = [0, 24], sizes = [64, 8], strides = [1, 1]} : vector<64x32xf32> to vector<64x8xf32>
    %25 = vector.shape_cast %21 : vector<64x8xf32> to vector<1x64x8xf32>
    %26 = vector.shape_cast %22 : vector<64x8xf32> to vector<1x64x8xf32>
    %27 = vector.shape_cast %23 : vector<64x8xf32> to vector<1x64x8xf32>
    %28 = vector.shape_cast %24 : vector<64x8xf32> to vector<1x64x8xf32>
    %29 = tpu.concatenate %25, %26, %27, %28 in 0 : vector<1x64x8xf32>, vector<1x64x8xf32>, vector<1x64x8xf32>, vector<1x64x8xf32> -> vector<4x64x8xf32>
    %30 = vector.shape_cast %29 : vector<4x64x8xf32> to vector<8x32x8xf32>
    %31 = arith.truncf %30 : vector<8x32x8xf32> to vector<8x32x8xbf16>
    %32 = vector.extract_strided_slice %9 {offsets = [0, 0], sizes = [64, 8], strides = [1, 1]} : vector<64x32xf32> to vector<64x8xf32>
    %33 = vector.extract_strided_slice %9 {offsets = [0, 8], sizes = [64, 8], strides = [1, 1]} : vector<64x32xf32> to vector<64x8xf32>
    %34 = vector.extract_strided_slice %9 {offsets = [0, 16], sizes = [64, 8], strides = [1, 1]} : vector<64x32xf32> to vector<64x8xf32>
    %35 = vector.extract_strided_slice %9 {offsets = [0, 24], sizes = [64, 8], strides = [1, 1]} : vector<64x32xf32> to vector<64x8xf32>
    %36 = vector.shape_cast %32 : vector<64x8xf32> to vector<1x64x8xf32>
    %37 = vector.shape_cast %33 : vector<64x8xf32> to vector<1x64x8xf32>
    %38 = vector.shape_cast %34 : vector<64x8xf32> to vector<1x64x8xf32>
    %39 = vector.shape_cast %35 : vector<64x8xf32> to vector<1x64x8xf32>
    %40 = tpu.concatenate %36, %37, %38, %39 in 0 : vector<1x64x8xf32>, vector<1x64x8xf32>, vector<1x64x8xf32>, vector<1x64x8xf32> -> vector<4x64x8xf32>
    %41 = vector.shape_cast %40 : vector<4x64x8xf32> to vector<8x32x8xf32>
    %42 = arith.truncf %41 : vector<8x32x8xf32> to vector<8x32x8xbf16>
    "tpu.trace_start"() <{level = 10 : i32, message = "gnd,gmd->gnm"}> : () -> ()
    %cst_5 = arith.constant dense<0.000000e+00> : vector<8x32x32xf32>
    %43 = tpu.matmul %20, %31, %cst_5 {dimension_numbers = #tpu.dot_dimension_numbers<[2], [2], [1], [1], [0, 0, 0, 1, 1, 1], [0], [0]>} : vector<8x32x8xbf16>, vector<8x32x8xbf16>, vector<8x32x32xf32> -> vector<8x32x32xf32>
    "tpu.trace_stop"() : () -> ()
    %c0_6 = arith.constant 0 : index
    %c0_7 = arith.constant 0 : index
    %44 = vector.load %arg5[%c0_6, %c0_7] : memref<32x32xf32, #tpu.memory_space<vmem>>, vector<32x32xf32>
    %45 = vector.shape_cast %44 : vector<32x32xf32> to vector<1x32x32xf32>
    %46 = vector.broadcast %45 : vector<1x32x32xf32> to vector<8x32x32xf32>
    %47 = arith.addf %43, %46 : vector<8x32x32xf32>
    %cst_8 = arith.constant dense<0xFF800000> : vector<8x32xf32>
    %48 = vector.multi_reduction <maximumf>, %47, %cst_8 [2] : vector<8x32x32xf32> to vector<8x32xf32>
    %49 = vector.shape_cast %48 : vector<8x32xf32> to vector<8x32x1xf32>
    %50 = vector.broadcast %49 : vector<8x32x1xf32> to vector<8x32x32xf32>
    %51 = arith.subf %47, %50 : vector<8x32x32xf32>
    %52 = math.exp %51 : vector<8x32x32xf32>
    %cst_9 = arith.constant dense<0.000000e+00> : vector<8x32xf32>
    %53 = vector.multi_reduction <add>, %52, %cst_9 [2] : vector<8x32x32xf32> to vector<8x32xf32>
    %54 = vector.shape_cast %53 : vector<8x32xf32> to vector<8x32x1xf32>
    %55 = arith.truncf %52 : vector<8x32x32xf32> to vector<8x32x32xbf16>
    "tpu.trace_start"() <{level = 10 : i32, message = "gnm,gmd->gnd"}> : () -> ()
    %cst_10 = arith.constant dense<0.000000e+00> : vector<8x32x8xf32>
    %56 = tpu.matmul %55, %42, %cst_10 {dimension_numbers = #tpu.dot_dimension_numbers<[2], [1], [1], [2], [0, 0, 0, 1, 1, 2], [0], [0]>} : vector<8x32x32xbf16>, vector<8x32x8xbf16>, vector<8x32x8xf32> -> vector<8x32x8xf32>
    "tpu.trace_stop"() : () -> ()
    %57 = tpu.reciprocal %54 {approx = true} : vector<8x32x1xf32> -> vector<8x32x1xf32>
    %58 = vector.broadcast %57 : vector<8x32x1xf32> to vector<8x32x8xf32>
    %59 = arith.mulf %56, %58 : vector<8x32x8xf32>
    %60 = vector.shape_cast %59 : vector<8x32x8xf32> to vector<4x64x8xf32>
    %61 = vector.extract_strided_slice %60 {offsets = [0, 0, 0], sizes = [1, 64, 8], strides = [1, 1, 1]} : vector<4x64x8xf32> to vector<1x64x8xf32>
    %62 = vector.shape_cast %61 : vector<1x64x8xf32> to vector<64x8xf32>
    %63 = vector.extract_strided_slice %60 {offsets = [1, 0, 0], sizes = [1, 64, 8], strides = [1, 1, 1]} : vector<4x64x8xf32> to vector<1x64x8xf32>
    %64 = vector.shape_cast %63 : vector<1x64x8xf32> to vector<64x8xf32>
    %65 = vector.extract_strided_slice %60 {offsets = [2, 0, 0], sizes = [1, 64, 8], strides = [1, 1, 1]} : vector<4x64x8xf32> to vector<1x64x8xf32>
    %66 = vector.shape_cast %65 : vector<1x64x8xf32> to vector<64x8xf32>
    %67 = vector.extract_strided_slice %60 {offsets = [3, 0, 0], sizes = [1, 64, 8], strides = [1, 1, 1]} : vector<4x64x8xf32> to vector<1x64x8xf32>
    %68 = vector.shape_cast %67 : vector<1x64x8xf32> to vector<64x8xf32>
    %69 = tpu.concatenate %62, %64, %66, %68 in 1 : vector<64x8xf32>, vector<64x8xf32>, vector<64x8xf32>, vector<64x8xf32> -> vector<64x32xf32>
    %70 = arith.truncf %69 : vector<64x32xf32> to vector<64x32xbf16>
    %c0_11 = arith.constant 0 : index
    %c0_12 = arith.constant 0 : index
    %71 = vector.load %arg3[%c0_11, %c0_12] : memref<32x32xbf16, #tpu.memory_space<vmem>>, vector<32x32xbf16>
    %cst_13 = arith.constant dense<0.000000e+00> : vector<64x32xf32>
    %72 = tpu.matmul %70, %71, %cst_13 {dimension_numbers = #tpu.dot_dimension_numbers<[1], [0], [0], [1], [0, 0, 1, 1], [], []>} : vector<64x32xbf16>, vector<32x32xbf16>, vector<64x32xf32> -> vector<64x32xf32>
    %c0_14 = arith.constant 0 : index
    %c0_15 = arith.constant 0 : index
    %73 = vector.load %arg4[%c0_14, %c0_15] : memref<1x32xf32, #tpu.memory_space<vmem>>, vector<1x32xf32>
    %74 = vector.broadcast %73 : vector<1x32xf32> to vector<64x32xf32>
    %75 = arith.addf %72, %74 : vector<64x32xf32>
    %76 = vector.shape_cast %75 : vector<64x32xf32> to vector<2x32x32xf32>
    %c0_16 = arith.constant 0 : index
    %c0_17 = arith.constant 0 : index
    %c0_18 = arith.constant 0 : index
    %77 = vector.load %arg6[%c0_16, %c0_17, %c0_18] : memref<2x32x32xf32, #tpu.memory_space<vmem>>, vector<2x32x32xf32>
    tpu.vector_store %arg6[%c0_16, %c0_17, %c0_18], %76 {strides = array<i32>} : memref<2x32x32xf32, #tpu.memory_space<vmem>>, vector<2x32x32xf32>,
    return
  }
  func.func @transform_0(%arg0: i32) -> (i32, i32, i32) {
    %c0_i32 = arith.constant 0 : i32
    %c0_i32_0 = arith.constant 0 : i32
    %c0_i32_1 = arith.constant 0 : i32
    return %arg0, %c0_i32, %c0_i32_0 : i32, i32, i32
  }
  func.func @transform_1(%arg0: i32) -> (i32, i32) {
    %c0_i32 = arith.constant 0 : i32
    %c0_i32_0 = arith.constant 0 : i32
    %c0_i32_1 = arith.constant 0 : i32
    return %c0_i32, %c0_i32_0 : i32, i32
  }
  func.func @transform_2(%arg0: i32) -> (i32, i32) {
    %c0_i32 = arith.constant 0 : i32
    %c0_i32_0 = arith.constant 0 : i32
    %c0_i32_1 = arith.constant 0 : i32
    return %c0_i32, %c0_i32_0 : i32, i32
  }
  func.func @transform_3(%arg0: i32) -> (i32, i32) {
    %c0_i32 = arith.constant 0 : i32
    %c0_i32_0 = arith.constant 0 : i32
    %c0_i32_1 = arith.constant 0 : i32
    return %c0_i32, %c0_i32_0 : i32, i32
  }
  func.func @transform_4(%arg0: i32) -> (i32, i32) {
    %c0_i32 = arith.constant 0 : i32
    %c0_i32_0 = arith.constant 0 : i32
    %c0_i32_1 = arith.constant 0 : i32
    return %c0_i32, %c0_i32_0 : i32, i32
  }
  func.func @transform_5(%arg0: i32) -> (i32, i32, i32) {
    %c0_i32 = arith.constant 0 : i32
    %c0_i32_0 = arith.constant 0 : i32
    %c0_i32_1 = arith.constant 0 : i32
    return %arg0, %c0_i32, %c0_i32_0 : i32, i32, i32
  }
}

</mosaic_0001>

<bundles_post_ra>
// kernel: tpu_custom_call.1
= control target key start
LH: loop header
LB: loop body
LE: loop exit
PB: predicated region body
PF: predicated region fallthrough
CT: control target
= control target key end

     0   :  { %10 = vsyncpa [#allocation3], 0  ;;  %s4163_s0 = inlined_call_operand.hbm [shape: f32[4,32,32], index: 0, kind: input, shape index: {}]   ;;  %s4164_s1 = inlined_call_operand.hbm [shape: bf16[32,96], index: 1, kind: input, shape index: {}]   ;;  %s4165_s2 = inlined_call_operand.hbm [shape: bf16[32,32], index: 2, kind: input, shape index: {}]   ;;  %s4166_s3 = inlined_call_operand.vmem [shape: f32[1,32], index: 3, kind: input, shape index: {}]   ;;  %s4167_s4 = inlined_call_operand.hbm [shape: f32[32,32], index: 4, kind: input, shape index: {}]   ;;  %s4168_s5 = inlined_call_operand.hbm [shape: f32[4,32,32], index: 5, kind: output, shape index: {}]  }
   0x1   :  { %12 = vsyncpa [#allocation3 + $0x1], 0 }
   0x2   :  { %13 = vsyncpa [#allocation6], 0 }
   0x3   :  { %14 = vsyncpa [#allocation9], 0 }
   0x4   :  { %15 = vsyncpa [#allocation4], 0 }
   0x5   :  { %17 = vsyncpa [#allocation4 + $0x1], 0  ;;  %s3300_s18 = smov 0   ;;  %s3302_s19 = smov 0  }
   0x6   :  { %s3304_s20 = smov 0   ;;  %s3306_s21 = smov 0  }
   0x7 LB: > { %s3321_s22 = sadd.s32 4294967295, %s3250_s21   ;;  %s2345_s23 = sadd.s32 4294967294, %s3250_s21   ;;  %s3250_s21 = sphi %s3306_s21, %s4191_s21   ;;  %s3246_s20 = sphi %s3304_s20, %s4190_s20   ;;  %s3242_s19 = sphi %s3302_s19, %s4189_s19   ;;  %s3238_s18 = sphi %s3300_s18, %s4188_s18  }
   0x8   : > { %p43_p0 = scmp.ne.s32.totalorder %s3242_s19, %s3238_s18  ;;  %p4169_p1 = scmp.eq.s32.totalorder %s3321_s22, 0 }
   0x9   : > { %p157_p3 = scmp.eq.s32.totalorder %s2345_s23, 1  ;;  %p2346_p5 = scmp.ge.s32.totalorder %s3250_s21, 1 }
   0xa   : > { %p3330_p4 = por %p4169_p1, %p43_p0  ;;  %p164_p7 = scmp.lt.s32.totalorder %s3250_s21, 3 }
   0xb   : > { %p3335_p6 = por %p157_p3, %p43_p0  ;;  %s3252_s27 = smov [#allocation5]  }
   0xc   : > { %s4172_s24 = scalar_select %p3330_p4, 1, 0 }
   0xd   : > { %s4173_s25 = scalar_select %p3335_p6, 1, 0 }
   0xe   : > { %p3340_p8 = pnand %p2346_p5, %p164_p7  ;;  %s176_s28 = sshll.u32 %s3252_s27, 4  ;;  %s3344_s28 = int_to_ptr.vmem [resolvable:$true] %s176_s28 }
   0xf   : > { %s3253_s30 = smov [#allocation7]   ;;  %s3254_s7 = smov [#allocation8]  }
  0x10   : > { %s4174_s26 = scalar_select %p3340_p8, 1, 0 }
  0x11   : > { %p2676_p9 = pneg %p3340_p8  ;;  %s189_s6 = sshll.u32 %s3253_s30, 4  ;;  %s3355_s6 = int_to_ptr.vmem [resolvable:$true] %s189_s6 }
  0x12   : > { %s3357_s8 = sshll.u32 %s3254_s7, 4  ;;  %s3062_s11 = scalar_lea.hbm %s4164_s1, 256  ;;  %s206_s8 = int_to_ptr.vmem [resolvable:$true] %s3357_s8 }
  0x13   : > { %p3351_p11 = pnand %p2676_p9, %p4169_p1  ;;  %p3063_p12 = scmp.ne.s32.totalorder %s4164_s1, %s3062_s11 }
  0x14   : > { %p3069_p5 = scmp.lt.u32.totalorder %s3062_s11, %s4164_s1 }
  0x15   : > { %p3367_p13 = pneg %p3351_p11 }
  0x17   : > { %p3065_p0 = pnand %p3367_p13, %p3063_p12 }
  0x19   : > { %p3066_p3 = pneg %p3065_p0 }
  0x1b   : > { %p3071_p7 = pnand %p3069_p5, %p3066_p3 }
  0x1d   : > { %3074 = shalt.err (!%p3071_p7)
}
  0x1e   : > { %s3075_s17 = scalar_lea.vmem %s3344_s28, 256  ;;  %p3083_p2 = scmp.lt.s32.totalorder %s3344_s28, %s3344_s28 }
  0x1f   : > { %p3076_p9 = scmp.ne.s32.totalorder %s3344_s28, %s3075_s17  ;;  %p3084_p6 = scmp.lt.s32.totalorder %s3075_s17, %s3075_s17 }
  0x21   : > { %p3078_p10 = pnand %p3076_p9, %p3367_p13  ;;  %p3085_p12 = por %p3084_p6, %p3083_p2 }
  0x23   : > { %p3079_p1 = pneg %p3078_p10 }
  0x25   : > { %p3086_p0 = pnand %p3085_p12, %p3079_p1 }
  0x27   : > { %3089 = shalt.err (!%p3086_p0)
}
  0x28   : > { %s3255_s23 = smov 64   ;;  %s3256_s27 = smov 4  }
  0x29   : > { %2679 = dma.hbm_to_vmem [thread:$0]  (!%p3351_p11), %s4164_s1, 256, %s3344_s28, [#allocation6], %s3255_s23, %s3255_s23, %s3256_s27  }
  0x2a   : > { %s3090_s11 = scalar_lea.hbm %s4165_s2, 256 }
  0x2b   : > { %p3091_p2 = scmp.ne.s32.totalorder %s4165_s2, %s3090_s11  ;;  %p3097_p10 = scmp.lt.u32.totalorder %s3090_s11, %s4165_s2 }
  0x2d   : > { %p3093_p1 = pnand %p3091_p2, %p3367_p13 }
  0x2f   : > { %p3094_p6 = pneg %p3093_p1 }
  0x31   : > { %p3099_p3 = pnand %p3097_p10, %p3094_p6 }
  0x33   : > { %3102 = shalt.err (!%p3099_p3)
}
  0x34   : > { %s3103_s28 = scalar_lea.vmem %s3355_s6, 256  ;;  %p3111_p12 = scmp.lt.s32.totalorder %s3355_s6, %s3355_s6 }
  0x35   : > { %p3104_p5 = scmp.ne.s32.totalorder %s3355_s6, %s3103_s28  ;;  %p3112_p0 = scmp.lt.s32.totalorder %s3103_s28, %s3103_s28 }
  0x37   : > { %p3106_p7 = pnand %p3104_p5, %p3367_p13  ;;  %p3113_p2 = por %p3112_p0, %p3111_p12 }
  0x39   : > { %p3107_p9 = pneg %p3106_p7 }
  0x3b   : > { %p3114_p1 = pnand %p3113_p2, %p3107_p9 }
  0x3d   : > { %3117 = shalt.err (!%p3114_p1)
}
  0x3e   : > { %2682 = dma.hbm_to_vmem [thread:$0]  (!%p3351_p11), %s4165_s2, 256, %s3355_s6, [#allocation6], %s3255_s23, %s3255_s23, %s3256_s27  }
  0x3f   : > { %s3118_s10 = scalar_lea.hbm %s4167_s4, 512 }
  0x40   : > { %p3119_p6 = scmp.ne.s32.totalorder %s4167_s4, %s3118_s10  ;;  %p3125_p5 = scmp.lt.u32.totalorder %s3118_s10, %s4167_s4 }
  0x42   : > { %p3121_p10 = pnand %p3119_p6, %p3367_p13 }
  0x44   : > { %p3122_p3 = pneg %p3121_p10 }
  0x46   : > { %p3127_p7 = pnand %p3125_p5, %p3122_p3 }
  0x48   : > { %3130 = shalt.err (!%p3127_p7)
}
  0x49   : > { %s3131_s16 = scalar_lea.vmem %s206_s8, 512  ;;  %p3139_p2 = scmp.lt.s32.totalorder %s206_s8, %s206_s8 }
  0x4a   : > { %p3132_p9 = scmp.ne.s32.totalorder %s206_s8, %s3131_s16  ;;  %p3140_p1 = scmp.lt.s32.totalorder %s3131_s16, %s3131_s16 }
  0x4c   : > { %p3134_p12 = pnand %p3132_p9, %p3367_p13  ;;  %p3141_p4 = por %p3140_p1, %p3139_p2 }
  0x4e   : > { %p3135_p0 = pneg %p3134_p12 }
  0x50   : > { %p3142_p8 = pnand %p3141_p4, %p3135_p0 }
  0x52   : > { %3145 = shalt.err (!%p3142_p8)
}
  0x53   : > { %s3257_s6 = smov 128   ;;  %s3258_s14 = smov 8  }
  0x54   : > { %2685 = dma.hbm_to_vmem [thread:$0]  (!%p3351_p11), %s4167_s4, 512, %s206_s8, [#allocation9], %s3257_s6, %s3257_s6, %s3258_s14  }
  0x55   : > { %s3434_s28 = sadd.s32 1, %s3250_s21   ;;  %s30_s30 = sadd.s32 1, %s3246_s20 }
  0x56   : > { %s27_s17 = ssub.s32 %s3250_s21, %s3434_s28  ;;  %p37_p8 = scmp.ne.s32.totalorder %s3246_s20, %s3242_s19 }
  0x57   : > { %p28_p4 = scmp.eq.s32.totalorder %s27_s17, 0  ;;  %p38_p13 = scmp.eq.s32.totalorder %s3250_s21, 0 }
  0x58   : > { %p2697_p6 = scmp.lt.s32.totalorder %s3250_s21, 2  ;;  %p4177_p3 = scmp.eq.s32.totalorder %s3321_s22, 1 }
  0x59   : > { %s3444_s7 = scalar_select %p28_p4, %s3246_s20, %s30_s30  }
  0x5a   : > { %p39_p10 = por %p38_p13, %p37_p8  ;;  %p3448_p5 = por %p4177_p3, %p37_p8 }
  0x5b   : > { %s219_s9 = sand.u32 1, %s3246_s20   ;;  %s2413_s10 = sshll.u32 %s3250_s21, 10 }
  0x5c   : > { %s2351_s8 = sshll.u32 %s219_s9, 6  ;;  %s3457_s13 = scalar_lea.hbm %s4163_s0, %s2413_s10 }
  0x5d   : > { %s223_s15 = scalar_lea.vmem [#allocation2], %s2351_s8  ;;  %p3459_p11 = pnand %p2697_p6, %p39_p10 }
  0x5e   : > { %s231_s16 = sshll.u32 %s223_s15, 4  ;;  %s3465_s27 = scalar_lea.sflag [#allocation3], %s219_s9  ;;  %s3463_s16 = int_to_ptr.vmem [resolvable:$true] %s231_s16 }
  0x5f   : > { %s3146_s17 = scalar_lea.hbm %s3457_s13, 1024  ;;  %p3148_p9 = pneg %p3459_p11 }
  0x60   : > { %p3147_p7 = scmp.ne.s32.totalorder %s3457_s13, %s3146_s17  ;;  %s3151_s8 = scalar_lea.hbm %s4163_s0, 2048 }
  0x61   : > { %p3152_p2 = scmp.lt.u32.totalorder %s3457_s13, %s4163_s0  ;;  %p3153_p1 = scmp.lt.u32.totalorder %s3151_s8, %s3146_s17 }
  0x62   : > { %p3149_p12 = pnand %p3148_p9, %p3147_p7  ;;  %p3155_p8 = scmp.lt.u32.totalorder %s3146_s17, %s3457_s13 }
  0x63   : > { %p3154_p4 = por %p3153_p1, %p3152_p2 }
  0x64   : > { %p3150_p0 = pneg %p3149_p12 }
  0x65   : > { %p3156_p13 = por %p3155_p8, %p3154_p4 }
  0x67   : > { %p3157_p6 = pnand %p3156_p13, %p3150_p0 }
  0x69   : > { %3160 = shalt.err (!%p3157_p6)
}
  0x6a   : > { %s3161_s9 = scalar_lea.vmem %s3463_s16, 1024  ;;  %s3259_s15 = smov [#allocation2]  }
  0x6b   : > { %p3162_p10 = scmp.ne.s32.totalorder %s3463_s16, %s3161_s9  ;;  %s3166_s30 = sshll.u32 %s3259_s15, 4  ;;  %s3167_s30 = int_to_ptr.vmem [resolvable:$false] %s3166_s30 }
  0x6c   : > { %s3168_s10 = scalar_lea.vmem %s3167_s30, 2048  ;;  %p3169_p12 = scmp.lt.s32.totalorder %s3463_s16, %s3167_s30 }
  0x6d   : > { %p3164_p3 = pnand %p3162_p10, %p3148_p9  ;;  %p3170_p2 = scmp.lt.s32.totalorder %s3168_s10, %s3161_s9 }
  0x6f   : > { %p3165_p7 = pneg %p3164_p3  ;;  %p3171_p1 = por %p3170_p2, %p3169_p12 }
  0x71   : > { %p3172_p4 = pnand %p3171_p1, %p3165_p7 }
  0x73   : > { %3175 = shalt.err (!%p3172_p4)
}
  0x74   : > { %2689 = dma.hbm_to_vmem [thread:$0]  (!%p3459_p11), %s3457_s13, 1024, %s3463_s16, %s3465_s27, %s3257_s6, %s3257_s6, %s3258_s14  }
  0x75   : > { %p4180_p9 = scmp.ne.s32.totalorder %s4174_s26, 0 }
  0x76   : > { %s3499_s17 = sand.u32 (!%p4180_p9), 1, %s3242_s19   ;;  %p4181_p0 = scmp.ne.s32.totalorder (!%p4180_p9), %s4172_s24, 0 }
  0x77   : > { %243 = sbr.rel (%p4180_p9) target bundleno = 1611 (0x64b), region = 40  ;;  %s2356_s8 = sshll.u32 (!%p4180_p9), %s3499_s17, 6 }
  0x78   : > { %s246_s11 = scalar_lea.sflag (!%p4180_p9), [#allocation3], %s3499_s17  ;;  %s249_s23 = scalar_lea.vmem (!%p4180_p9), [#allocation2], %s2356_s8 }
  0x7e   : > { %3221 = dma.done.wait (%p4181_p0), %s246_s11, 1024  }
  0x7f   : > { %3223 = vsyncadd (%p4181_p0), %s246_s11, 4294966272  ;;  %p4182_p11 = scmp.eq.s32.totalorder %s3321_s22, 0 }
  0x81   : > { %3225 = dma.done.wait (%p4182_p11), [#allocation6], 512   ;;  %p4183_p8 = pmov %p4182_p11 }
  0x83   : > { %3227 = vsyncadd (%p4183_p8), [#allocation6], 4294966784  ;;  %p4184_p13 = pmov %p4183_p8 }
  0x84   : > { %p4185_p6 = pmov %p4183_p8 }
  0x85   : > { %3229 = dma.done.wait (%p4184_p13), [#allocation9], 512  }
  0x86   : > { %3231 = vsyncadd (%p4185_p6), [#allocation9], 4294966784  ;;  %v2930_v0 = vld [vmem:[#allocation5] sm:$0xff]   ;;  %v2931_v1 = vld [vmem:[#allocation5 + $0x8] sm:$0xff]   ;;  %vm319_vm0 = vcmask 261120   ;;  %vm607_vm1 = vcmask 64512  }
  0x87   : > { %2492 = vmatprep.subr.bf16.mxu0 %v2930_v0  ;;  %v291_v2 = vld [vmem:[%s249_s23] sm:$0xff]  ;;  %v292_v3 = vld [vmem:[%s249_s23 + $0x8] sm:$0xff]  ;;  %v293_v5 = vld [vmem:[%s249_s23 + $0x10] sm:$0xff]  ;;  %s3260_s24 = smov 120   ;;  %s3261_s26 = smov 112   ;;  %vm2098_vm2 = vcmask 130048  }
  0x88   : > { %2493 = vmatpush3.bf16.msra.mxu0 %v2930_v0  ;;  %v299_v4 = vpack.c.bf16 %v292_v3, %v291_v2  ;;  %v294_v6 = vld [vmem:[%s249_s23 + $0x18] sm:$0xff]  ;;  %v295_v7 = vld [vmem:[%s249_s23 + $0x20] sm:$0xff]  ;;  %v296_v8 = vld [vmem:[%s249_s23 + $0x28] sm:$0xff]  ;;  %s3262_s6 = smov 104   ;;  %s3263_s14 = smov 96   ;;  %vm2107_vm3 = vcmask 195584  }
  0x89   : > { %2494 = vmatprep.subr.bf16.mxu0 %v2931_v1  ;;  %v300_v9 = vpack.c.bf16 %v294_v6, %v293_v5  ;;  %v301_v10 = vpack.c.bf16 %v296_v8, %v295_v7  ;;  %v297_v11 = vld [vmem:[%s249_s23 + $0x30] sm:$0xff]  ;;  %v298_v12 = vld [vmem:[%s249_s23 + $0x38] sm:$0xff]  ;;  %s3264_s13 = smov 64   ;;  %s3265_s16 = smov 8  }
  0x8a   : > { %2496 = vmatprep.mubr.msk.bf16.mxu0 %vm319_vm0, %v299_v4  ;;  %v302_v13 = vpack.c.bf16 %v298_v12, %v297_v11  ;;  %s3266_s27 = smov 16   ;;  %s3267_s12 = smov 24  }
  0x8b   : > { %s287_s30 = scalar_lea.vmem [#allocation10], %s2356_s8  ;;  %s2415_s10 = sshll.u32 %s3321_s22, 10 }
  0x8c   : > { %2495 = vmatpush3.bf16.msra.mxu0 %v2931_v1  ;;  %s2243_s11 = sshll.u32 %s287_s30, 4  ;;  %s2229_s22 = scalar_lea.sflag [#allocation4], %s3499_s17  ;;  %s4116_s11 = int_to_ptr.vmem [resolvable:$true] %s2243_s11 }
  0x8f   : > { %2497 = vmatmul.mubr.msk.bf16.vlgmr.msra.gmra.mrb[0].mxu0 %vm319_vm0, %v300_v9 }
  0x90   : > { %2500 = vmatprep.mubr.msk.bf16.mxu0 %vm319_vm0, %v301_v10 }
  0x97   : > { %2501 = vmatmul.mubr.msk.bf16.gmra.mrb[4].mxu0 %vm319_vm0, %v302_v13 }
 0x162   : > { %v2498_v14 = vpop.f32.mrb[0].mxu0 }
 0x163   : > { %v366_v15 = vpop.f32.mrb[1].mxu0  ;;  %v3521_v16 = vmul.f32 0.35355338, %v2498_v14 }
 0x164   : > { %v397_v17 = vmul.f32 0.35355338, %v366_v15  ;;  %v2499_v18 = vpop.f32.mrb[2].mxu0 }
 0x165   : > { %v3523_v19 = vmul.f32 0.35355338, %v2499_v18  ;;  %v369_v20 = vpop.f32.mrb[3].mxu0  ;;  %v2755_v21 = vpack.i.bf16 %v2499_v18, %v2498_v14  ;;  %v3527_v25 = vpack.c.bf16 %v2499_v18, %v2498_v14 }
 0x166   : > { %v398_v22 = vmul.f32 0.35355338, %v369_v20  ;;  %v2750_v23 = vpack.i.bf16 %v369_v20, %v366_v15  ;;  %v3525_v24 = vpack.c.bf16 %v369_v20, %v366_v15 }
 0x167   : > { %v3531_v26 = vpack.i.bf16 %v3523_v19, %v3521_v16  ;;  %v486_v29 = vpack.c.bf16 %v3523_v19, %v3521_v16 }
 0x168   : > { %2751 = vrot.lane.b32.xlu0 %v2750_v23, %s3260_s24  ;;  %v485_v27 = vpack.c.bf16 %v398_v22, %v397_v17  ;;  %v3534_v28 = vpack.i.bf16 %v398_v22, %v397_v17 }
 0x16a   : > { %v2502_v30 = vpop.f32.mrb[4].mxu0  ;;  %2508 = vmatprep.mubr.msk.bf16.mxu1 %vm607_vm1, %v485_v27 }
 0x16b   : > { %v382_v31 = vpop.f32.mrb[5].mxu0  ;;  %v3539_v32 = vmul.f32 0.35355338, %v2502_v30 }
 0x16c   : > { %v401_v33 = vmul.f32 0.35355338, %v382_v31  ;;  %2756 = vrot.lane.b32.xlu0 %v2755_v21, %s3260_s24  ;;  %v2503_v34 = vpop.f32.mrb[6].mxu0 }
 0x16d   : > { %v3542_v35 = vmul.f32 0.35355338, %v2503_v34  ;;  %v385_v36 = vpop.f32.mrb[7].mxu0  ;;  %v2765_v37 = vpack.i.bf16 %v2503_v34, %v2502_v30  ;;  %v3548_v42 = vpack.c.bf16 %v2503_v34, %v2502_v30 }
 0x16e   : > { %v402_v38 = vmul.f32 0.35355338, %v385_v36  ;;  %v2760_v39 = vpack.i.bf16 %v385_v36, %v382_v31  ;;  %v3546_v41 = vpack.c.bf16 %v385_v36, %v382_v31 }
 0x16f   : > { %v488_v40 = vpack.c.bf16 %v3542_v35, %v3539_v32  ;;  %v3552_v43 = vpack.i.bf16 %v3542_v35, %v3539_v32 }
 0x170   : > { %2771 = vrot.lane.b32.xlu0 %v2750_v23, %s3261_s26  ;;  %2761 = vrot.lane.b32.xlu1 %v2760_v39, %s3260_s24  ;;  %v487_v44 = vpack.c.bf16 %v402_v38, %v401_v33  ;;  %v3556_v45 = vpack.i.bf16 %v402_v38, %v401_v33 }
 0x172   : > { %2516 = vmatprep.mubr.msk.bf16.mxu0 %vm607_vm1, %v487_v44 }
 0x174   : > { %2781 = vrot.lane.b32.xlu0 %v2760_v39, %s3261_s26  ;;  %2766 = vrot.lane.b32.xlu1 %v2765_v37, %s3260_s24 }
 0x178   : > { %2791 = vrot.lane.b32.xlu0 %v2750_v23, %s3262_s6  ;;  %2776 = vrot.lane.b32.xlu1 %v2755_v21, %s3261_s26 }
 0x17c   : > { %2801 = vrot.lane.b32.xlu0 %v2760_v39, %s3262_s6  ;;  %2786 = vrot.lane.b32.xlu1 %v2765_v37, %s3261_s26 }
 0x180   : > { %2806 = vrot.lane.b32.xlu0 %v2765_v37, %s3262_s6  ;;  %2796 = vrot.lane.b32.xlu1 %v2755_v21, %s3262_s6 }
 0x184   : > { %603 = vrot.lane.b32.xlu1 %v3525_v24, %s3263_s14  ;;  %671 = vrot.lane.b32.xlu0 %v3546_v41, %s3263_s14 }
 0x188   : > { %605 = vrot.lane.b32.xlu1 %v3527_v25, %s3263_s14 }
 0x18c   : > { %673 = vrot.lane.b32.xlu1 %v3548_v42, %s3263_s14 }
 0x1da   : > { %v2752_v46 = vpop.permute.xlu0 %2751 }
 0x1db   : > { %v2754_v47 = vunpack.i.h.bf16 %v2752_v46  ;;  %v2753_v48 = vunpack.i.l.bf16 %v2752_v46 }
 0x1dd   : > { %v3575_v49 = vpack.c.bf16 %v2754_v47, %v2753_v48 }
 0x1de   : > { %v2757_v50 = vpop.permute.xlu0 %2756 }
 0x1df   : > { %v2759_v51 = vunpack.i.h.bf16 %v2757_v50  ;;  %v2758_v52 = vunpack.i.l.bf16 %v2757_v50  ;;  %738 = vrot.lane.b32.xlu0 %v3575_v49, %s3263_s14 }
 0x1e1   : > { %v3579_v53 = vpack.c.bf16 %v2759_v51, %v2758_v52 }
 0x1e2   : > { %v2772_v54 = vpop.permute.xlu0 %2771  ;;  %v2762_v55 = vpop.permute.xlu1 %2761 }
 0x1e3   : > { %v2764_v56 = vunpack.i.h.bf16 %v2762_v55  ;;  %v2763_v57 = vunpack.i.l.bf16 %v2762_v55  ;;  %740 = vrot.lane.b32.xlu1 %v3579_v53, %s3263_s14  ;;  %v2774_v63 = vunpack.i.h.bf16 %v2772_v54  ;;  %v2773_v0 = vunpack.i.l.bf16 %v2772_v54 }
 0x1e5   : > { %v3583_v58 = vpack.c.bf16 %v2764_v56, %v2763_v57  ;;  %v3595_v6 = vpack.c.bf16 %v2774_v63, %v2773_v0 }
 0x1e6   : > { %v2782_v59 = vpop.permute.xlu0 %2781  ;;  %v2767_v60 = vpop.permute.xlu1 %2766 }
 0x1e7   : > { %v2769_v61 = vunpack.i.h.bf16 %v2767_v60  ;;  %v2768_v62 = vunpack.i.l.bf16 %v2767_v60  ;;  %2811 = vrot.lane.b32.xlu1 %v3534_v28, %s3260_s24  ;;  %805 = vrot.lane.b32.xlu0 %v3583_v58, %s3263_s14  ;;  %v2784_v9 = vunpack.i.h.bf16 %v2782_v59  ;;  %v2783_v10 = vunpack.i.l.bf16 %v2782_v59 }
 0x1e9   : > { %v3589_v1 = vpack.c.bf16 %v2769_v61, %v2768_v62  ;;  %v591_v14 = vpack.c.bf16 %v2784_v9, %v2783_v10 }
 0x1ea   : > { %v2792_v2 = vpop.permute.xlu0 %2791  ;;  %v2777_v3 = vpop.permute.xlu1 %2776 }
 0x1eb   : > { %807 = vrot.lane.b32.xlu1 %v3589_v1, %s3263_s14  ;;  %2816 = vrot.lane.b32.xlu0 %v3531_v26, %s3260_s24  ;;  %v2779_v4 = vunpack.i.h.bf16 %v2777_v3  ;;  %v2778_v5 = vunpack.i.l.bf16 %v2777_v3  ;;  %v2794_v23 = vunpack.i.h.bf16 %v2792_v2  ;;  %v2793_v27 = vunpack.i.l.bf16 %v2792_v2 }
 0x1ed   : > { %v3601_v11 = vpack.c.bf16 %v2779_v4, %v2778_v5  ;;  %v593_v33 = vpack.c.bf16 %v2794_v23, %v2793_v27 }
 0x1ee   : > { %v2802_v7 = vpop.permute.xlu0 %2801  ;;  %v2787_v8 = vpop.permute.xlu1 %2786 }
 0x1ef   : > { %872 = vrot.lane.b32.xlu0 %v3595_v6, %s3263_s14  ;;  %2821 = vrot.lane.b32.xlu1 %v3556_v45, %s3260_s24  ;;  %v2789_v15 = vunpack.i.h.bf16 %v2787_v8  ;;  %v2788_v17 = vunpack.i.l.bf16 %v2787_v8  ;;  %v2804_v44 = vunpack.i.h.bf16 %v2802_v7  ;;  %v2803_v46 = vunpack.i.l.bf16 %v2802_v7 }
 0x1f1   : > { %v592_v31 = vpack.c.bf16 %v2789_v15, %v2788_v17  ;;  %v3627_v48 = vpack.c.bf16 %v2804_v44, %v2803_v46 }
 0x1f2   : > { %v2807_v12 = vpop.permute.xlu0 %2806  ;;  %v2797_v13 = vpop.permute.xlu1 %2796 }
 0x1f3   : > { %2826 = vrot.lane.b32.xlu0 %v3552_v43, %s3260_s24  ;;  %874 = vrot.lane.b32.xlu1 %v3601_v11, %s3263_s14  ;;  %v2799_v34 = vunpack.i.h.bf16 %v2797_v13  ;;  %v2798_v36 = vunpack.i.l.bf16 %v2797_v13  ;;  %v2809_v50 = vunpack.i.h.bf16 %v2807_v12  ;;  %v2808_v51 = vunpack.i.l.bf16 %v2807_v12  ;;  %s4113_s24 = scalar_lea.hbm %s4168_s5, %s2415_s10 }
 0x1f5   : > { %v594_v47 = vpack.c.bf16 %v2799_v34, %v2798_v36  ;;  %v3641_v52 = vpack.c.bf16 %v2809_v50, %v2808_v51 }
 0x1f6   : > { %v604_v18 = vpop.permute.xlu1 %603  ;;  %v672_v20 = vpop.permute.xlu0 %671 }
 0x1f7   : > { %2644 = vmatprep.subr.msk.bf16.mxu1 %vm607_vm1, %v604_v18  ;;  %939 = vrot.lane.b32.xlu0 %v591_v14, %s3263_s14  ;;  %v615_v21 = vsel %vm607_vm1, %v604_v18, 0  ;;  %v682_v22 = vsel %vm607_vm1, %v672_v20, 0 }
 0x1f8   : > { %2646 = vmatprep.subr.msk.bf16.mxu0 %vm607_vm1, %v672_v20  ;;  %2831 = vrot.lane.b32.xlu1 %v3534_v28, %s3261_s26 }
 0x1f9   : > { %2505 = vmatpush3.bf16.xpose.msra.mxu1 %v615_v21  ;;  %2513 = vmatpush3.bf16.xpose.msra.mxu0 %v682_v22 }
 0x1fa   : > { %v606_v30 = vpop.permute.xlu1 %605 }
 0x1fb   : > { %2645 = vmatprep.subr.msk.bf16.mxu1 %vm607_vm1, %v606_v30  ;;  %2836 = vrot.lane.b32.xlu0 %v3531_v26, %s3261_s26  ;;  %v618_v39 = vsel %vm607_vm1, %v606_v30, 0 }
 0x1fc   : > { %941 = vrot.lane.b32.xlu1 %v592_v31, %s3263_s14 }
 0x1fe   : > { %v674_v37 = vpop.permute.xlu1 %673 }
 0x1ff   : > { %1006 = vrot.lane.b32.xlu0 %v593_v33, %s3263_s14  ;;  %2647 = vmatprep.subr.msk.bf16.mxu0 %vm607_vm1, %v674_v37  ;;  %v685_v38 = vsel %vm607_vm1, %v674_v37, 0 }
 0x200   : > { %2841 = vrot.lane.b32.xlu1 %v3556_v45, %s3261_s26 }
 0x201   : > { %2507 = vmatpush3.bf16.xpose.msra.mxu1 %v618_v39  ;;  %2515 = vmatpush3.bf16.xpose.msra.mxu0 %v685_v38 }
 0x203   : > { %2846 = vrot.lane.b32.xlu0 %v3552_v43, %s3261_s26  ;;  %s3176_s26 = scalar_lea.vmem %s4116_s11, 1024 }
 0x204   : > { %1008 = vrot.lane.b32.xlu1 %v594_v47, %s3263_s14  ;;  %p3177_p10 = scmp.ne.s32.totalorder %s4116_s11, %s3176_s26 }
 0x206   : > { %p3178_p3 = pnand %p3177_p10, %p3448_p5 }
 0x207   : > { %1073 = vrot.lane.b32.xlu0 %v3627_v48, %s3263_s14 }
 0x208   : > { %2509 = vmatmul.mubr.msk.bf16.vlgmr.msra.gmra.mrb[0].mxu1 %vm607_vm1, %v486_v29  ;;  %2851 = vrot.lane.b32.xlu1 %v3534_v28, %s3262_s6  ;;  %p3179_p7 = pneg %p3178_p3 }
 0x209   : > { %2517 = vmatmul.mubr.msk.bf16.vlgmr.msra.gmra.mrb[8].mxu0 %vm607_vm1, %v488_v40 }
 0x20b   : > { %2856 = vrot.lane.b32.xlu0 %v3531_v26, %s3262_s6 }
 0x20c   : > { %1075 = vrot.lane.b32.xlu1 %v3641_v52, %s3263_s14 }
 0x20f   : > { %2861 = vrot.lane.b32.xlu0 %v3556_v45, %s3262_s6 }
 0x210   : > { %2866 = vrot.lane.b32.xlu1 %v3552_v43, %s3262_s6  ;;  %s3268_s6 = smov [#allocation10]  }
 0x211   : > { %s3180_s14 = sshll.u32 %s3268_s6, 4  ;;  %s3181_s14 = int_to_ptr.vmem [resolvable:$false] %s3180_s14 }
 0x212   : > { %p3183_p12 = scmp.lt.s32.totalorder %s4116_s11, %s3181_s14 }
 0x213   : > { %1503 = vrot.lane.b32.xlu0 %v3546_v41, %s3264_s13 }
 0x214   : > { %1442 = vrot.lane.b32.xlu1 %v3525_v24, %s3264_s13 }
 0x217   : > { %1564 = vrot.lane.b32.xlu0 %v3575_v49, %s3264_s13 }
 0x218   : > { %1444 = vrot.lane.b32.xlu1 %v3527_v25, %s3264_s13 }
 0x21b   : > { %1749 = vrot.lane.b32.xlu0 %v592_v31, %s3264_s13 }
 0x21c   : > { %1505 = vrot.lane.b32.xlu1 %v3548_v42, %s3264_s13 }
 0x21f   : > { %1625 = vrot.lane.b32.xlu0 %v3583_v58, %s3264_s13 }
 0x220   : > { %1566 = vrot.lane.b32.xlu1 %v3579_v53, %s3264_s13 }
 0x224   : > { %1686 = vrot.lane.b32.xlu1 %v3595_v6, %s3264_s13 }
 0x228   : > { %1627 = vrot.lane.b32.xlu1 %v3589_v1, %s3264_s13 }
 0x22c   : > { %1688 = vrot.lane.b32.xlu1 %v3601_v11, %s3264_s13 }
 0x230   : > { %1808 = vrot.lane.b32.xlu1 %v593_v33, %s3264_s13 }
 0x234   : > { %1810 = vrot.lane.b32.xlu1 %v594_v47, %s3264_s13 }
 0x238   : > { %1747 = vrot.lane.b32.xlu1 %v591_v14, %s3264_s13 }
 0x251   : > { %v739_v16 = vpop.permute.xlu0 %738 }
 0x252   : > { %2648 = vmatprep.subr.msk.bf16.mxu1 %vm607_vm1, %v739_v16  ;;  %v749_v19 = vsel %vm607_vm1, %v739_v16, 0 }
 0x253   : > { %2521 = vmatpush3.bf16.xpose.msra.mxu1 %v749_v19 }
 0x255   : > { %v741_v24 = vpop.permute.xlu1 %740 }
 0x256   : > { %2649 = vmatprep.subr.msk.bf16.mxu1 %vm607_vm1, %v741_v24  ;;  %v752_v32 = vsel %vm607_vm1, %v741_v24, 0 }
 0x259   : > { %v2812_v25 = vpop.permute.xlu1 %2811  ;;  %v806_v26 = vpop.permute.xlu0 %805 }
 0x25a   : > { %v2814_v28 = vunpack.i.h.bf16 %v2812_v25  ;;  %v2813_v29 = vunpack.i.l.bf16 %v2812_v25  ;;  %2650 = vmatprep.subr.msk.bf16.mxu0 %vm607_vm1, %v806_v26  ;;  %v816_v35 = vsel %vm607_vm1, %v806_v26, 0 }
 0x25b   : > { %2523 = vmatpush3.bf16.xpose.msra.mxu1 %v752_v32  ;;  %2529 = vmatpush3.bf16.xpose.msra.mxu0 %v816_v35 }
 0x25c   : > { %v489_v40 = vpack.c.bf16 %v2814_v28, %v2813_v29 }
 0x25d   : > { %v808_v41 = vpop.permute.xlu1 %807  ;;  %v2817_v42 = vpop.permute.xlu0 %2816 }
 0x25e   : > { %v2819_v43 = vunpack.i.h.bf16 %v2817_v42  ;;  %v2818_v45 = vunpack.i.l.bf16 %v2817_v42  ;;  %2524 = vmatprep.mubr.msk.bf16.mxu1 %vm607_vm1, %v489_v40  ;;  %2651 = vmatprep.subr.msk.bf16.mxu0 %vm607_vm1, %v808_v41  ;;  %v819_v57 = vsel %vm607_vm1, %v808_v41, 0 }
 0x260   : > { %v490_v49 = vpack.c.bf16 %v2819_v43, %v2818_v45 }
 0x261   : > { %v873_v53 = vpop.permute.xlu0 %872  ;;  %v2822_v54 = vpop.permute.xlu1 %2821 }
 0x262   : > { %v2824_v55 = vunpack.i.h.bf16 %v2822_v54  ;;  %v2823_v56 = vunpack.i.l.bf16 %v2822_v54  ;;  %2525 = vmatmul.mubr.msk.bf16.vlgmr.msra.gmra.mrb[4].mxu1 %vm607_vm1, %v490_v49  ;;  %2652 = vmatprep.subr.msk.bf16.mxu1 %vm607_vm1, %v873_v53  ;;  %v883_v58 = vsel %vm607_vm1, %v873_v53, 0 }
 0x263   : > { %2531 = vmatpush3.bf16.xpose.msra.mxu0 %v819_v57  ;;  %2537 = vmatpush3.bf16.xpose.msra.mxu1 %v883_v58  ;;  %v3721_v57 = vld [vmem:[#allocation8] sm:$0xff] }
 0x264   : > { %v491_v59 = vpack.c.bf16 %v2824_v55, %v2823_v56  ;;  %v3719_v55 = vld [vmem:[#allocation8 + $0x10] sm:$0xff] }
 0x265   : > { %v2827_v60 = vpop.permute.xlu0 %2826  ;;  %v875_v61 = vpop.permute.xlu1 %874 }
 0x266   : > { %v2829_v62 = vunpack.i.h.bf16 %v2827_v60  ;;  %v2828_v63 = vunpack.i.l.bf16 %v2827_v60  ;;  %2532 = vmatprep.mubr.msk.bf16.mxu0 %vm607_vm1, %v491_v59  ;;  %2653 = vmatprep.subr.msk.bf16.mxu1 %vm607_vm1, %v875_v61  ;;  %v886_v3 = vsel %vm607_vm1, %v875_v61, 0  ;;  %v3726_v61 = vld [vmem:[#allocation8 + $0x8] sm:$0xff] }
 0x268   : > { %v492_v0 = vpack.c.bf16 %v2829_v62, %v2828_v63 }
 0x269   : > { %v940_v1 = vpop.permute.xlu0 %939 }
 0x26a   : > { %v2832_v2 = vpop.permute.xlu1 %2831  ;;  %2533 = vmatmul.mubr.msk.bf16.vlgmr.msra.gmra.mrb[12].mxu0 %vm607_vm1, %v492_v0  ;;  %2654 = vmatprep.subr.msk.bf16.mxu0 %vm607_vm1, %v940_v1  ;;  %v950_v4 = vsel %vm607_vm1, %v940_v1, 0 }
 0x26b   : > { %v2834_v5 = vunpack.i.h.bf16 %v2832_v2  ;;  %v2833_v6 = vunpack.i.l.bf16 %v2832_v2  ;;  %2539 = vmatpush3.bf16.xpose.msra.mxu1 %v886_v3  ;;  %2545 = vmatpush3.bf16.xpose.msra.mxu0 %v950_v4  ;;  %v3733_v4 = vld [vmem:[#allocation8 + $0x18] sm:$0xff] }
 0x26d   : > { %v493_v7 = vpack.c.bf16 %v2834_v5, %v2833_v6  ;;  %v2837_v8 = vpop.permute.xlu0 %2836 }
 0x26e   : > { %v2839_v9 = vunpack.i.h.bf16 %v2837_v8  ;;  %v2838_v10 = vunpack.i.l.bf16 %v2837_v8  ;;  %v942_v11 = vpop.permute.xlu1 %941 }
 0x26f   : > { %2540 = vmatprep.mubr.msk.bf16.mxu1 %vm607_vm1, %v493_v7  ;;  %2655 = vmatprep.subr.msk.bf16.mxu0 %vm607_vm1, %v942_v11  ;;  %v953_v15 = vsel %vm607_vm1, %v942_v11, 0 }
 0x270   : > { %v494_v12 = vpack.c.bf16 %v2839_v9, %v2838_v10 }
 0x271   : > { %v1007_v13 = vpop.permute.xlu0 %1006 }
 0x272   : > { %v2842_v14 = vpop.permute.xlu1 %2841  ;;  %2541 = vmatmul.mubr.msk.bf16.vlgmr.msra.gmra.mrb[8].mxu1 %vm607_vm1, %v494_v12  ;;  %2656 = vmatprep.subr.msk.bf16.mxu1 %vm607_vm1, %v1007_v13  ;;  %v1017_v17 = vsel %vm607_vm1, %v1007_v13, 0 }
 0x273   : > { %v2844_v18 = vunpack.i.h.bf16 %v2842_v14  ;;  %v2843_v20 = vunpack.i.l.bf16 %v2842_v14  ;;  %2547 = vmatpush3.bf16.xpose.msra.mxu0 %v953_v15  ;;  %2553 = vmatpush3.bf16.xpose.msra.mxu1 %v1017_v17 }
 0x275   : > { %v495_v21 = vpack.c.bf16 %v2844_v18, %v2843_v20  ;;  %v2847_v22 = vpop.permute.xlu0 %2846 }
 0x276   : > { %v2849_v23 = vunpack.i.h.bf16 %v2847_v22  ;;  %v2848_v27 = vunpack.i.l.bf16 %v2847_v22  ;;  %v1009_v30 = vpop.permute.xlu1 %1008 }
 0x277   : > { %2548 = vmatprep.mubr.msk.bf16.mxu0 %vm607_vm1, %v495_v21  ;;  %2657 = vmatprep.subr.msk.bf16.mxu1 %vm607_vm1, %v1009_v30  ;;  %v1020_v37 = vsel %vm607_vm1, %v1009_v30, 0 }
 0x278   : > { %v496_v31 = vpack.c.bf16 %v2849_v23, %v2848_v27 }
 0x279   : > { %v1074_v33 = vpop.permute.xlu0 %1073 }
 0x27a   : > { %v1084_v34 = vsel %vm607_vm1, %v1074_v33, 0  ;;  %v2852_v36 = vpop.permute.xlu1 %2851  ;;  %2549 = vmatmul.mubr.msk.bf16.vlgmr.msra.gmra.mrb[16].mxu0 %vm607_vm1, %v496_v31  ;;  %2658 = vmatprep.subr.msk.bf16.mxu0 %vm607_vm1, %v1074_v33 }
 0x27b   : > { %v2854_v38 = vunpack.i.h.bf16 %v2852_v36  ;;  %v2853_v39 = vunpack.i.l.bf16 %v2852_v36  ;;  %2555 = vmatpush3.bf16.xpose.msra.mxu1 %v1020_v37  ;;  %2561 = vmatpush3.bf16.xpose.msra.mxu0 %v1084_v34 }
 0x27d   : > { %v497_v44 = vpack.c.bf16 %v2854_v38, %v2853_v39  ;;  %v2857_v46 = vpop.permute.xlu0 %2856 }
 0x27e   : > { %v2859_v47 = vunpack.i.h.bf16 %v2857_v46  ;;  %v2858_v50 = vunpack.i.l.bf16 %v2857_v46  ;;  %v1076_v51 = vpop.permute.xlu1 %1075 }
 0x27f   : > { %2556 = vmatprep.mubr.msk.bf16.mxu1 %vm607_vm1, %v497_v44  ;;  %2659 = vmatprep.subr.msk.bf16.mxu0 %vm607_vm1, %v1076_v51  ;;  %v1087_v24 = vsel %vm607_vm1, %v1076_v51, 0 }
 0x280   : > { %v498_v16 = vpack.c.bf16 %v2859_v47, %v2858_v50 }
 0x281   : > { %v2862_v19 = vpop.permute.xlu0 %2861 }
 0x282   : > { %v2864_v25 = vunpack.i.h.bf16 %v2862_v19  ;;  %v2863_v26 = vunpack.i.l.bf16 %v2862_v19  ;;  %v2867_v28 = vpop.permute.xlu1 %2866  ;;  %2557 = vmatmul.mubr.msk.bf16.vlgmr.msra.gmra.mrb[12].mxu1 %vm607_vm1, %v498_v16 }
 0x283   : > { %2563 = vmatpush3.bf16.xpose.msra.mxu0 %v1087_v24  ;;  %v2869_v32 = vunpack.i.h.bf16 %v2867_v28  ;;  %v2868_v35 = vunpack.i.l.bf16 %v2867_v28 }
 0x284   : > { %v499_v29 = vpack.c.bf16 %v2864_v25, %v2863_v26 }
 0x285   : > { %v1504_v40 = vpop.permute.xlu0 %1503  ;;  %v500_v42 = vpack.c.bf16 %v2869_v32, %v2868_v35 }
 0x286   : > { %v1443_v41 = vpop.permute.xlu1 %1442  ;;  %2564 = vmatprep.mubr.msk.bf16.mxu0 %vm607_vm1, %v499_v29  ;;  %2576 = vmatprep.subr.bf16.mxu0 %v1504_v40 }
 0x287   : > { %2568 = vmatprep.subr.bf16.mxu1 %v1443_v41 }
 0x288   : > { %2569 = vmatpush3.bf16.msra.mxu1 %v1443_v41 }
 0x289   : > { %v3710_v43 = vpop.permute.xlu0 %1564 }
 0x28a   : > { %v1445_v45 = vpop.permute.xlu1 %1444  ;;  %2565 = vmatmul.mubr.msk.bf16.vlgmr.msra.gmra.mrb[20].mxu0 %vm607_vm1, %v500_v42 }
 0x28b   : > { %2570 = vmatprep.subr.bf16.mxu1 %v1445_v45  ;;  %2577 = vmatpush3.bf16.msra.mxu0 %v1504_v40 }
 0x28c   : > { %2571 = vmatpush3.bf16.msra.mxu1 %v1445_v45 }
 0x28d   : > { %2584 = vmatprep.subr.bf16.mxu1 %v3710_v43  ;;  %v3714_v49 = vpop.permute.xlu0 %1749 }
 0x28e   : > { %v1506_v53 = vpop.permute.xlu1 %1505 }
 0x28f   : > { %2578 = vmatprep.subr.bf16.mxu0 %v1506_v53 }
 0x290   : > { %2579 = vmatpush3.bf16.msra.mxu0 %v1506_v53 }
 0x291   : > { %v3716_v54 = vpop.permute.xlu0 %1625 }
 0x292   : > { %2592 = vmatprep.subr.bf16.mxu0 %v3716_v54  ;;  %v3810_v41 = vpop.permute.xlu1 %1566 }
 0x2db   : > { %v2510_v56 = vpop.f32.mrb[0].mxu1 }
 0x2dc   : > { %v3724_v58 = vadd.f32 %v2510_v56, %v3719_v55  ;;  %v2518_v59 = vpop.f32.mrb[8].mxu0  ;;  %v654_v60 = vpop.f32.mrb[1].mxu1 }
 0x2dd   : > { %v721_v62 = vpop.f32.mrb[9].mxu0  ;;  %v2511_v63 = vpop.f32.mrb[2].mxu1  ;;  %v3729_v0 = vadd.f32 %v654_v60, %v3721_v57  ;;  %v3739_v7 = vadd.f32 %v2518_v59, %v3719_v55 }
 0x2de   : > { %v2519_v1 = vpop.f32.mrb[10].mxu0  ;;  %v657_v2 = vpop.f32.mrb[3].mxu1  ;;  %v1144_v3 = vsel %vm319_vm0, %v3724_v58, -inf  ;;  %v3744_v9 = vadd.f32 %v2511_v63, %v3733_v4  ;;  %v3749_v11 = vadd.f32 %v721_v62, %v3721_v57 }
 0x2df   : > { %v3736_v5 = vadd.f32 %v657_v2, %v3726_v61  ;;  %v724_v6 = vpop.f32.mrb[11].mxu0  ;;  %1145 = vmax.xlane.f32.xlu0 %v1144_v3  ;;  %v1138_v10 = vsel %vm319_vm0, %v3729_v0, -inf  ;;  %v1156_v12 = vsel %vm319_vm0, %v3739_v7, -inf  ;;  %v3754_v13 = vadd.f32 %v2519_v1, %v3733_v4  ;;  %v3827_v1 = vpop.permute.xlu1 %1686 }
 0x2e0   : > { %v1147_v14 = vsel %vm319_vm0, %v3744_v9, -inf  ;;  %v1150_v15 = vsel %vm319_vm0, %v3749_v11, -inf  ;;  %v3761_v17 = vadd.f32 %v724_v6, %v3726_v61 }
 0x2e1   : > { %v1141_v8 = vsel %vm319_vm0, %v3736_v5, -inf  ;;  %v1159_v18 = vsel %vm319_vm0, %v3754_v13, -inf }
 0x2e2   : > { %1142 = vmax.xlane.f32.xlu1 %v1141_v8  ;;  %v1153_v20 = vsel %vm319_vm0, %v3761_v17, -inf }
 0x2e3   : > { %1139 = vmax.xlane.f32.xlu0 %v1138_v10 }
 0x2e6   : > { %1157 = vmax.xlane.f32.xlu1 %v1156_v12 }
 0x2e7   : > { %1148 = vmax.xlane.f32.xlu0 %v1147_v14 }
 0x2ea   : > { %1151 = vmax.xlane.f32.xlu1 %v1150_v15 }
 0x2eb   : > { %1160 = vmax.xlane.f32.xlu0 %v1159_v18 }
 0x2ef   : > { %1154 = vmax.xlane.f32.xlu0 %v1153_v20 }
 0x335   : > { %v2526_v21 = vpop.f32.mrb[4].mxu1 }
 0x336   : > { %v3768_v22 = vadd.f32 %v2526_v21, %v3719_v55  ;;  %v788_v23 = vpop.f32.mrb[5].mxu1  ;;  %v3844_v21 = vpop.permute.xlu1 %1627 }
 0x337   : > { %v2527_v27 = vpop.f32.mrb[6].mxu1  ;;  %v3771_v30 = vadd.f32 %v788_v23, %v3721_v57 }
 0x338   : > { %v3774_v31 = vadd.f32 %v2527_v27, %v3733_v4  ;;  %v791_v33 = vpop.f32.mrb[7].mxu1  ;;  %v1168_v34 = vsel %vm319_vm0, %v3768_v22, -inf }
 0x339   : > { %1169 = vmax.xlane.f32.xlu1 %v1168_v34  ;;  %v3779_v36 = vadd.f32 %v791_v33, %v3726_v61  ;;  %v1162_v38 = vsel %vm319_vm0, %v3771_v30, -inf }
 0x33a   : > { %v1171_v37 = vsel %vm319_vm0, %v3774_v31, -inf }
 0x33b   : > { %1172 = vmax.xlane.f32.xlu0 %v1171_v37  ;;  %v1165_v47 = vsel %vm319_vm0, %v3779_v36, -inf }
 0x33d   : > { %v2534_v39 = vpop.f32.mrb[12].mxu0  ;;  %1163 = vmax.xlane.f32.xlu1 %v1162_v38 }
 0x33e   : > { %v3786_v44 = vadd.f32 %v2534_v39, %v3719_v55  ;;  %v855_v46 = vpop.f32.mrb[13].mxu0 }
 0x33f   : > { %v2535_v50 = vpop.f32.mrb[14].mxu0  ;;  %1166 = vmax.xlane.f32.xlu0 %v1165_v47  ;;  %v3791_v51 = vadd.f32 %v855_v46, %v3721_v57  ;;  %v3854_v46 = vpop.permute.xlu1 %1688 }
 0x340   : > { %v3794_v16 = vadd.f32 %v2535_v50, %v3733_v4  ;;  %v858_v19 = vpop.f32.mrb[15].mxu0  ;;  %v1180_v24 = vsel %vm319_vm0, %v3786_v44, -inf }
 0x341   : > { %1181 = vmax.xlane.f32.xlu1 %v1180_v24  ;;  %v3799_v25 = vadd.f32 %v858_v19, %v3726_v61  ;;  %v1174_v28 = vsel %vm319_vm0, %v3791_v51, -inf }
 0x342   : > { %v1183_v26 = vsel %vm319_vm0, %v3794_v16, -inf }
 0x343   : > { %1184 = vmax.xlane.f32.xlu0 %v1183_v26  ;;  %v1177_v40 = vsel %vm319_vm0, %v3799_v25, -inf }
 0x345   : > { %v2542_v29 = vpop.f32.mrb[8].mxu1  ;;  %1175 = vmax.xlane.f32.xlu1 %v1174_v28 }
 0x346   : > { %v3806_v32 = vadd.f32 %v2542_v29, %v3719_v55  ;;  %v922_v35 = vpop.f32.mrb[9].mxu1 }
 0x347   : > { %v2543_v42 = vpop.f32.mrb[10].mxu1  ;;  %1178 = vmax.xlane.f32.xlu0 %v1177_v40  ;;  %v3813_v45 = vadd.f32 %v922_v35, %v3721_v57  ;;  %v3868_v35 = vpop.permute.xlu1 %1808 }
 0x348   : > { %v3816_v53 = vadd.f32 %v2543_v42, %v3733_v4  ;;  %v925_v56 = vpop.f32.mrb[11].mxu1  ;;  %v1192_v59 = vsel %vm319_vm0, %v3806_v32, -inf }
 0x349   : > { %1193 = vmax.xlane.f32.xlu1 %v1192_v59  ;;  %v3821_v60 = vadd.f32 %v925_v56, %v3726_v61  ;;  %v1186_v63 = vsel %vm319_vm0, %v3813_v45, -inf }
 0x34a   : > { %v1195_v62 = vsel %vm319_vm0, %v3816_v53, -inf }
 0x34b   : > { %1196 = vmax.xlane.f32.xlu0 %v1195_v62  ;;  %v1189_v8 = vsel %vm319_vm0, %v3821_v60, -inf }
 0x34d   : > { %v2550_v2 = vpop.f32.mrb[16].mxu0  ;;  %1187 = vmax.xlane.f32.xlu1 %v1186_v63 }
 0x34e   : > { %v3830_v3 = vadd.f32 %v2550_v2, %v3719_v55  ;;  %v989_v6 = vpop.f32.mrb[17].mxu0 }
 0x34f   : > { %v3835_v10 = vadd.f32 %v989_v6, %v3721_v57  ;;  %v2551_v12 = vpop.f32.mrb[18].mxu0  ;;  %1190 = vmax.xlane.f32.xlu0 %v1189_v8  ;;  %v3883_v6 = vpop.permute.xlu1 %1810 }
 0x350   : > { %v992_v14 = vpop.f32.mrb[19].mxu0  ;;  %v3840_v18 = vadd.f32 %v2551_v12, %v3733_v4  ;;  %v1204_v20 = vsel %vm319_vm0, %v3830_v3, -inf }
 0x351   : > { %v1198_v15 = vsel %vm319_vm0, %v3835_v10, -inf  ;;  %v3847_v27 = vadd.f32 %v992_v14, %v3726_v61 }
 0x352   : > { %1199 = vmax.xlane.f32.xlu1 %v1198_v15  ;;  %v1207_v34 = vsel %vm319_vm0, %v3840_v18, -inf }
 0x353   : > { %1205 = vmax.xlane.f32.xlu0 %v1204_v20  ;;  %v1201_v19 = vsel %vm319_vm0, %v3847_v27, -inf  ;;  %v3897_v15 = vpop.permute.xlu1 %1747 }
 0x355   : > { %v2558_v23 = vpop.f32.mrb[12].mxu1 }
 0x356   : > { %v1056_v33 = vpop.f32.mrb[13].mxu1  ;;  %v3859_v50 = vadd.f32 %v2558_v23, %v3719_v55 }
 0x357   : > { %v3852_v37 = vadd.f32 %v1056_v33, %v3721_v57  ;;  %v2559_v38 = vpop.f32.mrb[14].mxu1  ;;  %1208 = vmax.xlane.f32.xlu0 %v1207_v34 }
 0x358   : > { %v1059_v39 = vpop.f32.mrb[15].mxu1  ;;  %v3864_v26 = vadd.f32 %v2559_v38, %v3733_v4  ;;  %v1216_v29 = vsel %vm319_vm0, %v3859_v50, -inf }
 0x359   : > { %v1210_v47 = vsel %vm319_vm0, %v3852_v37, -inf  ;;  %v3874_v59 = vadd.f32 %v1059_v39, %v3726_v61 }
 0x35a   : > { %1211 = vmax.xlane.f32.xlu1 %v1210_v47  ;;  %v1219_v63 = vsel %vm319_vm0, %v3864_v26, -inf }
 0x35b   : > { %1202 = vmax.xlane.f32.xlu0 %v1201_v19  ;;  %v1213_v8 = vsel %vm319_vm0, %v3874_v59, -inf }
 0x35d   : > { %v2566_v24 = vpop.f32.mrb[20].mxu0 }
 0x35e   : > { %v1123_v28 = vpop.f32.mrb[21].mxu0 }
 0x35f   : > { %v2567_v40 = vpop.f32.mrb[22].mxu0  ;;  %1217 = vmax.xlane.f32.xlu0 %v1216_v29  ;;  %v3893_v12 = vadd.f32 %v1123_v28, %v3721_v57 }
 0x360   : > { %v3871_v42 = vadd.f32 %v2567_v40, %v3733_v4  ;;  %v1126_v56 = vpop.f32.mrb[23].mxu0  ;;  %v3886_v4 = vadd.f32 %v2566_v24, %v3719_v55 }
 0x361   : > { %v3877_v62 = vadd.f32 %v1126_v56, %v3726_v61  ;;  %v1222_v55 = vsel %vm319_vm0, %v3893_v12, -inf }
 0x362   : > { %v1231_v2 = vsel %vm319_vm0, %v3871_v42, -inf  ;;  %v1228_v14 = vsel %vm319_vm0, %v3886_v4, -inf }
 0x363   : > { %1220 = vmax.xlane.f32.xlu0 %v1219_v63  ;;  %1232 = vmax.xlane.f32.xlu1 %v1231_v2  ;;  %v1225_v61 = vsel %vm319_vm0, %v3877_v62, -inf }
 0x367   : > { %1214 = vmax.xlane.f32.xlu0 %v1213_v8  ;;  %1226 = vmax.xlane.f32.xlu1 %v1225_v61 }
 0x36b   : > { %1229 = vmax.xlane.f32.xlu0 %v1228_v14 }
 0x36c   : > { %v1146_v20 = vpop.xlane.xlu0 %1145 }
 0x36d   : > { %v1236_v33 = vsub.f32 %v3724_v58, %v1146_v20 }
 0x36f   : > { %v1143_v23 = vpop.xlane.xlu1 %1142  ;;  %1223 = vmax.xlane.f32.xlu0 %v1222_v55  ;;  %v1270_v24 = vmul.f32 1.442695, %v1236_v33 }
 0x370   : > { %v1235_v34 = vsub.f32 %v3736_v5, %v1143_v23  ;;  %v1140_v38 = vpop.xlane.xlu0 %1139 }
 0x371   : > { %v1234_v57 = vsub.f32 %v3729_v0, %v1140_v38 }
 0x372   : > { %v1268_v39 = vmul.f32 1.442695, %v1235_v34 }
 0x373   : > { %v1266_v47 = vmul.f32 1.442695, %v1234_v57  ;;  %v1158_v19 = vpop.xlane.xlu1 %1157 }
 0x374   : > { %2934 = vpow2.f32 %v1268_v39  ;;  %v1149_v28 = vpop.xlane.xlu0 %1148  ;;  %v1240_v5 = vsub.f32 %v3739_v7, %v1158_v19 }
 0x375   : > { %2936 = vpow2.f32 %v1266_v47  ;;  %v1237_v29 = vsub.f32 %v3744_v9, %v1149_v28 }
 0x376   : > { %2938 = vpow2.f32 %v1270_v24  ;;  %v1278_v20 = vmul.f32 1.442695, %v1240_v5 }
 0x377   : > { %v1272_v40 = vmul.f32 1.442695, %v1237_v29  ;;  %v1152_v56 = vpop.xlane.xlu1 %1151 }
 0x378   : > { %v1238_v63 = vsub.f32 %v3749_v11, %v1152_v56  ;;  %v1161_v58 = vpop.xlane.xlu0 %1160  ;;  %1871 = vrot.lane.b32.xlu1 %v3641_v52, %s3264_s13 }
 0x379   : > { %2940 = vpow2.f32 %v1272_v40  ;;  %v1241_v0 = vsub.f32 %v3754_v13, %v1161_v58 }
 0x37a   : > { %v1274_v2 = vmul.f32 1.442695, %v1238_v63 }
 0x37b   : > { %v1280_v8 = vmul.f32 1.442695, %v1241_v0 }
 0x37c   : > { %v1155_v61 = vpop.xlane.xlu0 %1154  ;;  %2942 = vpow2.f32 %v1274_v2 }
 0x37d   : > { %v1239_v14 = vsub.f32 %v3761_v17, %v1155_v61  ;;  %2944 = vpow2.f32 %v1280_v8 }
 0x37e   : > { %v3911_v9 = vpop.eup %2934 }
 0x37f   : > { %v3913_v55 = vpop.eup %2936  ;;  %v1276_v11 = vmul.f32 1.442695, %v1239_v14 }
 0x380   : > { %v1426_v52 = vpack.c.bf16 %v3911_v9, %v3913_v55  ;;  %v3917_v13 = vpop.eup %2938 }
 0x381   : > { %2946 = vpow2.f32 %v1276_v11 }
 0x382   : > { %2948 = vpow2.f32 %v1278_v20  ;;  %2572 = vmatprep.mubr.msk.bf16.mxu1 %vm319_vm0, %v1426_v52 }
 0x383   : > { %v3920_v7 = vpop.eup %2940 }
 0x384   : > { %v1427_v17 = vpack.c.bf16 %v3920_v7, %v3917_v13 }
 0x385   : > { %1869 = vrot.lane.b32.xlu0 %v3627_v48, %s3264_s13  ;;  %s3182_s13 = scalar_lea.vmem %s3181_s14, 2048 }
 0x386   : > { %2573 = vmatmul.mubr.msk.bf16.vlgmr.msra.gmra.mrb[16].mxu1 %vm319_vm0, %v1427_v17  ;;  %v3929_v23 = vpop.eup %2942  ;;  %p3184_p2 = scmp.lt.s32.totalorder %s3182_s13, %s3176_s26 }
 0x387   : > { %2585 = vmatpush3.bf16.msra.mxu1 %v3710_v43  ;;  %v3931_v33 = vpop.eup %2944 }
 0x388   : > { %2586 = vmatprep.subr.bf16.mxu1 %v3810_v41  ;;  %p3185_p1 = por %p3184_p2, %p3183_p12 }
 0x38a   : > { %p3186_p4 = pnand %p3185_p1, %p3179_p7 }
 0x38b   : > { %v3933_v34 = vpop.eup %2946  ;;  %2587 = vmatpush3.bf16.msra.mxu1 %v3810_v41 }
 0x38c   : > { %v3936_v38 = vpop.eup %2948  ;;  %2600 = vmatprep.subr.bf16.mxu1 %v3827_v1  ;;  %v1428_v48 = vpack.c.bf16 %v3933_v34, %v3929_v23 }
 0x38d   : > { %v1429_v43 = vpack.c.bf16 %v3931_v33, %v3936_v38 }
 0x38e   : > { %2580 = vmatprep.mubr.msk.bf16.mxu0 %vm319_vm0, %v1428_v48 }
 0x38f   : > { %2581 = vmatmul.mubr.msk.bf16.vlgmr.msra.gmra.mrb[24].mxu0 %vm319_vm0, %v1429_v43 }
 0x390   : > { %2593 = vmatpush3.bf16.msra.mxu0 %v3716_v54 }
 0x391   : > { %2594 = vmatprep.subr.bf16.mxu0 %v3844_v21 }
 0x394   : > { %2595 = vmatpush3.bf16.msra.mxu0 %v3844_v21 }
 0x395   : > { %2608 = vmatprep.subr.bf16.mxu0 %v3897_v15 }
 0x3c6   : > { %v1170_v41 = vpop.xlane.xlu1 %1169 }
 0x3c7   : > { %v1244_v57 = vsub.f32 %v3768_v22, %v1170_v41 }
 0x3c8   : > { %v1173_v39 = vpop.xlane.xlu0 %1172 }
 0x3c9   : > { %v1286_v47 = vmul.f32 1.442695, %v1244_v57  ;;  %v1245_v19 = vsub.f32 %v3774_v31, %v1173_v39 }
 0x3ca   : > { %v1164_v24 = vpop.xlane.xlu1 %1163 }
 0x3cb   : > { %2950 = vpow2.f32 %v1286_v47  ;;  %v1242_v28 = vsub.f32 %v3771_v30, %v1164_v24  ;;  %v1288_v29 = vmul.f32 1.442695, %v1245_v19 }
 0x3cc   : > { %v1167_v40 = vpop.xlane.xlu0 %1166 }
 0x3cd   : > { %v1282_v54 = vmul.f32 1.442695, %v1242_v28  ;;  %v1243_v56 = vsub.f32 %v3779_v36, %v1167_v40 }
 0x3ce   : > { %v1182_v63 = vpop.xlane.xlu1 %1181 }
 0x3cf   : > { %2952 = vpow2.f32 %v1282_v54  ;;  %v1284_v21 = vmul.f32 1.442695, %v1243_v56  ;;  %v1248_v58 = vsub.f32 %v3786_v44, %v1182_v63 }
 0x3d0   : > { %2954 = vpow2.f32 %v1288_v29  ;;  %v1185_v22 = vpop.xlane.xlu0 %1184 }
 0x3d1   : > { %2956 = vpow2.f32 %v1284_v21  ;;  %v1294_v0 = vmul.f32 1.442695, %v1248_v58  ;;  %v1249_v31 = vsub.f32 %v3794_v16, %v1185_v22 }
 0x3d2   : > { %v1176_v5 = vpop.xlane.xlu1 %1175 }
 0x3d3   : > { %2958 = vpow2.f32 %v1294_v0  ;;  %v1296_v2 = vmul.f32 1.442695, %v1249_v31  ;;  %v1246_v30 = vsub.f32 %v3791_v51, %v1176_v5 }
 0x3d4   : > { %v1179_v8 = vpop.xlane.xlu0 %1178 }
 0x3d5   : > { %v2951_v61 = vpop.eup %2950  ;;  %2960 = vpow2.f32 %v1296_v2  ;;  %v1290_v36 = vmul.f32 1.442695, %v1246_v30  ;;  %v1247_v14 = vsub.f32 %v3799_v25, %v1179_v8 }
 0x3d6   : > { %v1194_v20 = vpop.xlane.xlu1 %1193  ;;  %v1360_v44 = vsel %vm319_vm0, %v2951_v61, 0.0 }
 0x3d7   : > { %2962 = vpow2.f32 %v1290_v36  ;;  %v1292_v11 = vmul.f32 1.442695, %v1247_v14  ;;  %v1252_v52 = vsub.f32 %v3806_v32, %v1194_v20  ;;  %1361 = vadd.xlane.f32.xlu0 %v1360_v44 }
 0x3d8   : > { %v1197_v16 = vpop.xlane.xlu0 %1196 }
 0x3d9   : > { %v2953_v17 = vpop.eup %2952  ;;  %2964 = vpow2.f32 %v1292_v11  ;;  %v1302_v48 = vmul.f32 1.442695, %v1252_v52  ;;  %v1253_v51 = vsub.f32 %v3816_v53, %v1197_v16 }
 0x3da   : > { %v2955_v43 = vpop.eup %2954  ;;  %v1188_v41 = vpop.xlane.xlu1 %1187  ;;  %v1354_v57 = vsel %vm319_vm0, %v2953_v17, 0.0 }
 0x3db   : > { %v2957_v39 = vpop.eup %2956  ;;  %2966 = vpow2.f32 %v1302_v48  ;;  %v1304_v25 = vmul.f32 1.442695, %v1253_v51  ;;  %v1250_v47 = vsub.f32 %v3813_v45, %v1188_v41  ;;  %1355 = vadd.xlane.f32.xlu0 %v1354_v57  ;;  %v1431_v53 = vpack.c.bf16 %v2955_v43, %v2951_v61 }
 0x3dc   : > { %v1191_v19 = vpop.xlane.xlu0 %1190  ;;  %v1357_v32 = vsel %vm319_vm0, %v2957_v39, 0.0  ;;  %v1430_v24 = vpack.c.bf16 %v2957_v39, %v2953_v17  ;;  %v1363_v54 = vsel %vm319_vm0, %v2955_v43, 0.0 }
 0x3dd   : > { %v2959_v28 = vpop.eup %2958  ;;  %2968 = vpow2.f32 %v1304_v25  ;;  %v1298_v29 = vmul.f32 1.442695, %v1250_v47  ;;  %v1251_v40 = vsub.f32 %v3821_v60, %v1191_v19  ;;  %1358 = vadd.xlane.f32.xlu1 %v1357_v32 }
 0x3de   : > { %2588 = vmatprep.mubr.msk.bf16.mxu1 %vm319_vm0, %v1430_v24  ;;  %v1372_v60 = vsel %vm319_vm0, %v2959_v28, 0.0 }
 0x3df   : > { %v2961_v56 = vpop.eup %2960  ;;  %2970 = vpow2.f32 %v1298_v29  ;;  %v1300_v63 = vmul.f32 1.442695, %v1251_v40  ;;  %2589 = vmatmul.mubr.msk.bf16.vlgmr.msra.gmra.mrb[20].mxu1 %vm319_vm0, %v1431_v53  ;;  %1364 = vadd.xlane.f32.xlu0 %v1363_v54  ;;  %v1200_v45 = vpop.xlane.xlu1 %1199 }
 0x3e0   : > { %2601 = vmatpush3.bf16.msra.mxu1 %v3827_v1  ;;  %v1254_v21 = vsub.f32 %v3835_v10, %v1200_v45  ;;  %v1206_v58 = vpop.xlane.xlu0 %1205  ;;  %v1375_v31 = vsel %vm319_vm0, %v2961_v56, 0.0  ;;  %v1433_v61 = vpack.c.bf16 %v2961_v56, %v2959_v28 }
 0x3e1   : > { %v2963_v22 = vpop.eup %2962  ;;  %2972 = vpow2.f32 %v1300_v63  ;;  %2602 = vmatprep.subr.bf16.mxu1 %v3854_v46  ;;  %1373 = vadd.xlane.f32.xlu1 %v1372_v60  ;;  %v1256_v36 = vsub.f32 %v3830_v3, %v1206_v58 }
 0x3e2   : > { %v1306_v0 = vmul.f32 1.442695, %v1254_v21  ;;  %v1366_v1 = vsel %vm319_vm0, %v2963_v22, 0.0 }
 0x3e3   : > { %v2965_v5 = vpop.eup %2964  ;;  %1376 = vadd.xlane.f32.xlu0 %v1375_v31  ;;  %v1310_v3 = vmul.f32 1.442695, %v1256_v36 }
 0x3e4   : > { %2974 = vpow2.f32 %v1306_v0  ;;  %2603 = vmatpush3.bf16.msra.mxu1 %v3854_v46  ;;  %v1209_v2 = vpop.xlane.xlu0 %1208  ;;  %v1432_v10 = vpack.c.bf16 %v2965_v5, %v2963_v22  ;;  %v1369_v14 = vsel %vm319_vm0, %v2965_v5, 0.0 }
 0x3e5   : > { %v2967_v30 = vpop.eup %2966  ;;  %v1257_v8 = vsub.f32 %v3840_v18, %v1209_v2  ;;  %2616 = vmatprep.subr.bf16.mxu1 %v3868_v35  ;;  %1367 = vadd.xlane.f32.xlu1 %v1366_v1 }
 0x3e6   : > { %2596 = vmatprep.mubr.msk.bf16.mxu0 %vm319_vm0, %v1432_v10  ;;  %v1384_v18 = vsel %vm319_vm0, %v2967_v30, 0.0 }
 0x3e7   : > { %v2969_v20 = vpop.eup %2968  ;;  %1370 = vadd.xlane.f32.xlu0 %v1369_v14  ;;  %2597 = vmatmul.mubr.msk.bf16.vlgmr.msra.gmra.mrb[28].mxu0 %vm319_vm0, %v1433_v61  ;;  %v1312_v46 = vmul.f32 1.442695, %v1257_v8  ;;  %v1212_v52 = vpop.xlane.xlu1 %1211 }
 0x3e8   : > { %2609 = vmatpush3.bf16.msra.mxu0 %v3897_v15  ;;  %v1203_v44 = vpop.xlane.xlu0 %1202  ;;  %v1387_v17 = vsel %vm319_vm0, %v2969_v20, 0.0  ;;  %v1258_v43 = vsub.f32 %v3852_v37, %v1212_v52  ;;  %v1435_v39 = vpack.c.bf16 %v2969_v20, %v2967_v30 }
 0x3e9   : > { %v2971_v11 = vpop.eup %2970  ;;  %v1255_v16 = vsub.f32 %v3847_v27, %v1203_v44  ;;  %2610 = vmatprep.subr.bf16.mxu0 %v3714_v49  ;;  %1385 = vadd.xlane.f32.xlu1 %v1384_v18  ;;  %2976 = vpow2.f32 %v1312_v46 }
 0x3ea   : > { %v1378_v41 = vsel %vm319_vm0, %v2971_v11, 0.0  ;;  %v1314_v37 = vmul.f32 1.442695, %v1258_v43 }
 0x3eb   : > { %v2973_v48 = vpop.eup %2972  ;;  %v1308_v51 = vmul.f32 1.442695, %v1255_v16  ;;  %1388 = vadd.xlane.f32.xlu0 %v1387_v17 }
 0x3ec   : > { %2611 = vmatpush3.bf16.msra.mxu0 %v3714_v49  ;;  %v1218_v15 = vpop.xlane.xlu0 %1217  ;;  %v1434_v57 = vpack.c.bf16 %v2973_v48, %v2971_v11  ;;  %v1381_v47 = vsel %vm319_vm0, %v2973_v48, 0.0 }
 0x3ed   : > { %2978 = vpow2.f32 %v1308_v51  ;;  %v1260_v27 = vsub.f32 %v3859_v50, %v1218_v15  ;;  %1379 = vadd.xlane.f32.xlu1 %v1378_v41 }
 0x3ee   : > { %v2975_v25 = vpop.eup %2974  ;;  %2980 = vpow2.f32 %v1310_v3  ;;  %2604 = vmatprep.mubr.msk.bf16.mxu1 %vm319_vm0, %v1434_v57  ;;  %v1330_v57 = vsel %vm319_vm0, %v3913_v55, 0.0  ;;  %v1351_v55 = vsel %vm319_vm0, %v3931_v33, 0.0 }
 0x3ef   : > { %v1318_v19 = vmul.f32 1.442695, %v1260_v27  ;;  %1382 = vadd.xlane.f32.xlu0 %v1381_v47  ;;  %2605 = vmatmul.mubr.msk.bf16.vlgmr.msra.gmra.mrb[24].mxu1 %vm319_vm0, %v1435_v39  ;;  %v1390_v49 = vsel %vm319_vm0, %v2975_v25, 0.0  ;;  %v1333_v27 = vsel %vm319_vm0, %v3911_v9, 0.0  ;;  %v1336_v39 = vsel %vm319_vm0, %v3917_v13, 0.0 }
 0x3f0   : > { %2617 = vmatpush3.bf16.msra.mxu1 %v3868_v35  ;;  %v1221_v32 = vpop.xlane.xlu0 %1220  ;;  %v1233_v24 = vpop.xlane.xlu1 %1232  ;;  %v1342_v47 = vsel %vm319_vm0, %v3929_v23, 0.0  ;;  %v1348_v9 = vsel %vm319_vm0, %v3936_v38, 0.0 }
 0x3f1   : > { %2982 = vpow2.f32 %v1318_v19  ;;  %v1261_v50 = vsub.f32 %v3864_v26, %v1221_v32  ;;  %2618 = vmatprep.subr.bf16.mxu1 %v3883_v6  ;;  %1391 = vadd.xlane.f32.xlu1 %v1390_v49  ;;  %v1265_v22 = vsub.f32 %v3871_v42, %v1233_v24  ;;  %v1345_v19 = vsel %vm319_vm0, %v3933_v34, 0.0 }
 0x3f2   : > { %2984 = vpow2.f32 %v1314_v37 }
 0x3f3   : > { %v1320_v28 = vmul.f32 1.442695, %v1261_v50  ;;  %v2977_v54 = vpop.eup %2976  ;;  %v1328_v10 = vmul.f32 1.442695, %v1265_v22 }
 0x3f4   : > { %2619 = vmatpush3.bf16.msra.mxu1 %v3883_v6  ;;  %v1215_v29 = vpop.xlane.xlu0 %1214  ;;  %v1227_v40 = vpop.xlane.xlu1 %1226  ;;  %v1399_v18 = vsel %vm319_vm0, %v2977_v54, 0.0 }
 0x3f5   : > { %2986 = vpow2.f32 %v1320_v28  ;;  %v1259_v53 = vsub.f32 %v3874_v59, %v1215_v29  ;;  %v1263_v63 = vsub.f32 %v3877_v62, %v1227_v40 }
 0x3f7   : > { %v2979_v56 = vpop.eup %2978  ;;  %v1316_v35 = vmul.f32 1.442695, %v1259_v53  ;;  %v1324_v0 = vmul.f32 1.442695, %v1263_v63 }
 0x3f8   : > { %v2981_v45 = vpop.eup %2980  ;;  %v1230_v21 = vpop.xlane.xlu0 %1229  ;;  %v1393_v26 = vsel %vm319_vm0, %v2979_v56, 0.0  ;;  %v1436_v58 = vpack.c.bf16 %v2979_v56, %v2975_v25  ;;  %v1339_v25 = vsel %vm319_vm0, %v3920_v7, 0.0 }
 0x3f9   : > { %2988 = vpow2.f32 %v1316_v35  ;;  %v1264_v60 = vsub.f32 %v3886_v4, %v1230_v21  ;;  %1394 = vadd.xlane.f32.xlu0 %v1393_v26  ;;  %v1437_v6 = vpack.c.bf16 %v2977_v54, %v2981_v45  ;;  %v1872_v36 = vpop.permute.xlu1 %1871  ;;  %v1396_v46 = vsel %vm319_vm0, %v2981_v45, 0.0 }
 0x3fa   : > { %2612 = vmatprep.mubr.msk.bf16.mxu0 %vm319_vm0, %v1436_v58  ;;  %2990 = vpow2.f32 %v1324_v0 }
 0x3fb   : > { %v2983_v59 = vpop.eup %2982  ;;  %2613 = vmatmul.mubr.msk.bf16.vlgmr.msra.gmra.mrb[32].mxu0 %vm319_vm0, %v1437_v6  ;;  %v1326_v31 = vmul.f32 1.442695, %v1264_v60 }
 0x3fc   : > { %v1224_v62 = vpop.xlane.xlu0 %1223  ;;  %v1408_v5 = vsel %vm319_vm0, %v2983_v59, 0.0  ;;  %v2985_v1 = vpop.eup %2984 }
 0x3fd   : > { %v1262_v2 = vsub.f32 %v3893_v12, %v1224_v62  ;;  %1409 = vadd.xlane.f32.xlu1 %v1408_v5  ;;  %2992 = vpow2.f32 %v1326_v31  ;;  %v1402_v61 = vsel %vm319_vm0, %v2985_v1, 0.0 }
 0x3ff   : > { %v2987_v4 = vpop.eup %2986  ;;  %v1322_v30 = vmul.f32 1.442695, %v1262_v2 }
 0x400   : > { %v1870_v42 = vpop.permute.xlu0 %1869  ;;  %v1411_v8 = vsel %vm319_vm0, %v2987_v4, 0.0  ;;  %v1439_v44 = vpack.c.bf16 %v2987_v4, %v2983_v59 }
 0x401   : > { %2994 = vpow2.f32 %v1322_v30  ;;  %1412 = vadd.xlane.f32.xlu0 %v1411_v8  ;;  %2624 = vmatprep.subr.bf16.mxu0 %v1870_v42 }
 0x402   : > { %2996 = vpow2.f32 %v1328_v10  ;;  %1403 = vadd.xlane.f32.xlu1 %v1402_v61  ;;  %2625 = vmatpush3.bf16.msra.mxu0 %v1870_v42 }
 0x403   : > { %v2989_v12 = vpop.eup %2988  ;;  %2626 = vmatprep.subr.bf16.mxu0 %v1872_v36 }
 0x404   : > { %v1405_v14 = vsel %vm319_vm0, %v2989_v12, 0.0  ;;  %v1438_v20 = vpack.c.bf16 %v2989_v12, %v2985_v1  ;;  %v2991_v11 = vpop.eup %2990 }
 0x405   : > { %1406 = vadd.xlane.f32.xlu0 %v1405_v14  ;;  %v1417_v48 = vsel %vm319_vm0, %v2991_v11, 0.0 }
 0x406   : > { %1397 = vadd.xlane.f32.xlu1 %v1396_v46  ;;  %2620 = vmatprep.mubr.msk.bf16.mxu1 %vm319_vm0, %v1438_v20 }
 0x407   : > { %2627 = vmatpush3.bf16.msra.mxu0 %v1872_v36  ;;  %2621 = vmatmul.mubr.msk.bf16.vlgmr.msra.gmra.mrb[28].mxu1 %vm319_vm0, %v1439_v44  ;;  %v2993_v52 = vpop.eup %2992 }
 0x408   : > { %v1420_v15 = vsel %vm319_vm0, %v2993_v52, 0.0 }
 0x409   : > { %1400 = vadd.xlane.f32.xlu0 %v1399_v18 }
 0x40b   : > { %v2995_v16 = vpop.eup %2994 }
 0x40c   : > { %v2997_v3 = vpop.eup %2996  ;;  %v1414_v17 = vsel %vm319_vm0, %v2995_v16, 0.0  ;;  %v1440_v51 = vpack.c.bf16 %v2991_v11, %v2995_v16 }
 0x40d   : > { %1415 = vadd.xlane.f32.xlu1 %v1414_v17  ;;  %1418 = vadd.xlane.f32.xlu0 %v1417_v48  ;;  %v1441_v43 = vpack.c.bf16 %v2997_v3, %v2993_v52  ;;  %v1423_v41 = vsel %vm319_vm0, %v2997_v3, 0.0 }
 0x40e   : > { %2628 = vmatprep.mubr.msk.bf16.mxu0 %vm319_vm0, %v1440_v51 }
 0x40f   : > { %2629 = vmatmul.mubr.msk.bf16.vlgmr.msra.gmra.mrb[36].mxu0 %vm319_vm0, %v1441_v43 }
 0x411   : > { %1421 = vadd.xlane.f32.xlu1 %v1420_v15  ;;  %1424 = vadd.xlane.f32.xlu0 %v1423_v41 }
 0x415   : > { %1331 = vadd.xlane.f32.xlu1 %v1330_v57  ;;  %1334 = vadd.xlane.f32.xlu0 %v1333_v27  ;;  %v2932_v27 = vld [vmem:[#allocation7] sm:$0xff]  }
 0x416   : > { %2632 = vmatprep.subr.bf16.mxu1 %v2932_v27 }
 0x417   : > { %2633 = vmatpush3.bf16.msra.mxu1 %v2932_v27 }
 0x419   : > { %1337 = vadd.xlane.f32.xlu1 %v1336_v39  ;;  %1340 = vadd.xlane.f32.xlu0 %v1339_v25 }
 0x41d   : > { %1343 = vadd.xlane.f32.xlu1 %v1342_v47  ;;  %1346 = vadd.xlane.f32.xlu0 %v1345_v19 }
 0x421   : > { %1349 = vadd.xlane.f32.xlu1 %v1348_v9  ;;  %1352 = vadd.xlane.f32.xlu0 %v1351_v55 }
 0x459   : > { %v4035_v13 = vpop.f32.mrb[16].mxu1 }
 0x45a   : > { %v4037_v7 = vpop.f32.mrb[17].mxu1 }
 0x45b   : > { %v4039_v49 = vpop.f32.mrb[18].mxu1 }
 0x45c   : > { %v4041_v23 = vpop.f32.mrb[19].mxu1 }
 0x462   : > { %v4043_v37 = vpop.f32.mrb[24].mxu0 }
 0x463   : > { %v4045_v34 = vpop.f32.mrb[25].mxu0 }
 0x464   : > { %v4047_v32 = vpop.f32.mrb[26].mxu0  ;;  %v1362_v24 = vpop.xlane.xlu0 %1361 }
 0x465   : > { %v4049_v38 = vpop.f32.mrb[27].mxu0  ;;  %2998 = vrcp.f32 %v1362_v24 }
 0x468   : > { %v1356_v33 = vpop.xlane.xlu0 %1355 }
 0x469   : > { %3000 = vrcp.f32 %v1356_v33 }
 0x46a   : > { %v1359_v50 = vpop.xlane.xlu1 %1358 }
 0x46c   : > { %v1365_v28 = vpop.xlane.xlu0 %1364 }
 0x46d   : > { %3002 = vrcp.f32 %v1365_v28 }
 0x46e   : > { %v1374_v29 = vpop.xlane.xlu1 %1373  ;;  %3004 = vrcp.f32 %v1359_v50 }
 0x46f   : > { %3006 = vrcp.f32 %v1374_v29  ;;  %v2999_v21 = vpop.eup %2998 }
 0x470   : > { %v1377_v40 = vpop.xlane.xlu0 %1376 }
 0x471   : > { %3008 = vrcp.f32 %v1377_v40 }
 0x472   : > { %v1368_v53 = vpop.xlane.xlu1 %1367 }
 0x473   : > { %3010 = vrcp.f32 %v1368_v53  ;;  %v3001_v60 = vpop.eup %3000 }
 0x474   : > { %v1371_v54 = vpop.xlane.xlu0 %1370 }
 0x475   : > { %3012 = vrcp.f32 %v1371_v54 }
 0x476   : > { %v1386_v56 = vpop.xlane.xlu1 %1385 }
 0x477   : > { %v3003_v59 = vpop.eup %3002  ;;  %3014 = vrcp.f32 %v1386_v56 }
 0x478   : > { %v1389_v35 = vpop.xlane.xlu0 %1388  ;;  %v3005_v31 = vpop.eup %3004 }
 0x479   : > { %3016 = vrcp.f32 %v1389_v35  ;;  %v3007_v61 = vpop.eup %3006 }
 0x47a   : > { %v1380_v63 = vpop.xlane.xlu1 %1379 }
 0x47b   : > { %3018 = vrcp.f32 %v1380_v63  ;;  %v3009_v12 = vpop.eup %3008 }
 0x47c   : > { %v1383_v45 = vpop.xlane.xlu0 %1382 }
 0x47d   : > { %3020 = vrcp.f32 %v1383_v45  ;;  %v3011_v20 = vpop.eup %3010 }
 0x47e   : > { %v1392_v26 = vpop.xlane.xlu1 %1391 }
 0x47f   : > { %v3013_v18 = vpop.eup %3012  ;;  %3022 = vrcp.f32 %v1392_v26 }
 0x481   : > { %v3015_v15 = vpop.eup %3014 }
 0x483   : > { %v3017_v39 = vpop.eup %3016 }
 0x485   : > { %v3019_v19 = vpop.eup %3018 }
 0x486   : > { %v1395_v6 = vpop.xlane.xlu0 %1394 }
 0x487   : > { %v3021_v55 = vpop.eup %3020 }
 0x489   : > { %v3023_v54 = vpop.eup %3022 }
 0x48a   : > { %v1410_v1 = vpop.xlane.xlu1 %1409 }
 0x48e   : > { %v1413_v30 = vpop.xlane.xlu0 %1412 }
 0x48f   : > { %v1404_v46 = vpop.xlane.xlu1 %1403 }
 0x492   : > { %v1407_v11 = vpop.xlane.xlu0 %1406 }
 0x493   : > { %v1398_v41 = vpop.xlane.xlu1 %1397 }
 0x494   : > { %3024 = vrcp.f32 %v1398_v41 }
 0x496   : > { %v1401_v25 = vpop.xlane.xlu0 %1400 }
 0x497   : > { %3026 = vrcp.f32 %v1401_v25 }
 0x498   : > { %3028 = vrcp.f32 %v1395_v6 }
 0x499   : > { %3030 = vrcp.f32 %v1410_v1 }
 0x49a   : > { %3032 = vrcp.f32 %v1413_v30 }
 0x49b   : > { %3034 = vrcp.f32 %v1404_v46 }
 0x49c   : > { %3036 = vrcp.f32 %v1407_v11 }
 0x49e   : > { %v3025_v35 = vpop.eup %3024 }
 0x4a1   : > { %v3027_v45 = vpop.eup %3026 }
 0x4b2   : > { %v2590_v58 = vpop.f32.mrb[20].mxu1 }
 0x4b3   : > { %v1610_v22 = vpop.f32.mrb[21].mxu1  ;;  %v1972_v62 = vmul.f32 %v2999_v21, %v2590_v58  ;;  %v1419_v21 = vpop.xlane.xlu0 %1418 }
 0x4b4   : > { %v2591_v0 = vpop.f32.mrb[22].mxu1  ;;  %v1970_v10 = vmul.f32 %v3001_v60, %v1610_v22  ;;  %v3029_v58 = vpop.eup %3028  ;;  %3038 = vrcp.f32 %v1419_v21 }
 0x4b5   : > { %v1973_v5 = vmul.f32 %v3003_v59, %v2591_v0  ;;  %v1613_v2 = vpop.f32.mrb[23].mxu1  ;;  %v1416_v60 = vpop.xlane.xlu1 %1415 }
 0x4b6   : > { %v1971_v4 = vmul.f32 %v3005_v31, %v1613_v2  ;;  %v3031_v1 = vpop.eup %3030 }
 0x4b7   : > { %v2870_v42 = vpack.i.bf16 %v1973_v5, %v1972_v62  ;;  %v1425_v2 = vpop.xlane.xlu0 %1424  ;;  %v3033_v30 = vpop.eup %3032 }
 0x4b8   : > { %v2875_v8 = vpack.i.bf16 %v1971_v4, %v1970_v10  ;;  %v2933_v4 = vld [vmem:[#allocation7 + $0x8] sm:$0xff]   ;;  %3040 = vrcp.f32 %v1425_v2 }
 0x4b9   : > { %2871 = vrot.lane.b32.xlu0 %v2870_v42, %s3265_s16  ;;  %v1422_v10 = vpop.xlane.xlu1 %1421  ;;  %2634 = vmatprep.subr.bf16.mxu1 %v2933_v4 }
 0x4ba   : > { %v2598_v36 = vpop.f32.mrb[28].mxu0  ;;  %2876 = vrot.lane.b32.xlu1 %v2875_v8, %s3265_s16  ;;  %3042 = vrcp.f32 %v1422_v10  ;;  %2635 = vmatpush3.bf16.msra.mxu1 %v2933_v4 }
 0x4bb   : > { %v1671_v14 = vpop.f32.mrb[29].mxu0  ;;  %v1976_v52 = vmul.f32 %v3007_v61, %v2598_v36  ;;  %3044 = vrcp.f32 %v1416_v60  ;;  %v3035_v61 = vpop.eup %3034 }
 0x4bc   : > { %v2599_v44 = vpop.f32.mrb[30].mxu0  ;;  %v1974_v17 = vmul.f32 %v3011_v20, %v1671_v14 }
 0x4bd   : > { %v1977_v16 = vmul.f32 %v3009_v12, %v2599_v44  ;;  %v1674_v3 = vpop.f32.mrb[31].mxu0  ;;  %v3037_v12 = vpop.eup %3036 }
 0x4be   : > { %v1975_v48 = vmul.f32 %v3013_v18, %v1674_v3 }
 0x4bf   : > { %v2880_v51 = vpack.i.bf16 %v1977_v16, %v1976_v52  ;;  %v3039_v16 = vpop.eup %3038 }
 0x4c0   : > { %v2885_v43 = vpack.i.bf16 %v1975_v48, %v1974_v17 }
 0x4c1   : > { %2881 = vrot.lane.b32.xlu1 %v2880_v51, %s3265_s16 }
 0x4c2   : > { %v2606_v57 = vpop.f32.mrb[24].mxu1  ;;  %2886 = vrot.lane.b32.xlu0 %v2885_v43, %s3265_s16  ;;  %v3041_v17 = vpop.eup %3040 }
 0x4c3   : > { %v1732_v47 = vpop.f32.mrb[25].mxu1  ;;  %v1980_v24 = vmul.f32 %v3015_v15, %v2606_v57 }
 0x4c4   : > { %v2607_v9 = vpop.f32.mrb[26].mxu1  ;;  %v1978_v28 = vmul.f32 %v3019_v19, %v1732_v47  ;;  %v3043_v51 = vpop.eup %3042 }
 0x4c5   : > { %v1981_v33 = vmul.f32 %v3017_v39, %v2607_v9  ;;  %v1735_v50 = vpop.f32.mrb[27].mxu1  ;;  %v3045_v15 = vpop.eup %3044 }
 0x4c6   : > { %v1979_v29 = vmul.f32 %v3021_v55, %v1735_v50  ;;  %v1332_v9 = vpop.xlane.xlu1 %1331 }
 0x4c7   : > { %v2890_v40 = vpack.i.bf16 %v1981_v33, %v1980_v24  ;;  %v1335_v24 = vpop.xlane.xlu0 %1334 }
 0x4c8   : > { %v2895_v53 = vpack.i.bf16 %v1979_v29, %v1978_v28  ;;  %3046 = vrcp.f32 %v1335_v24 }
 0x4c9   : > { %2891 = vrot.lane.b32.xlu1 %v2890_v40, %s3266_s27 }
 0x4ca   : > { %v1338_v55 = vpop.xlane.xlu1 %1337 }
 0x4cb   : > { %v1341_v50 = vpop.xlane.xlu0 %1340 }
 0x4cc   : > { %3048 = vrcp.f32 %v1341_v50 }
 0x4cd   : > { %2896 = vrot.lane.b32.xlu1 %v2895_v53, %s3266_s27  ;;  %3050 = vrcp.f32 %v1338_v55 }
 0x4ce   : > { %v2614_v56 = vpop.f32.mrb[32].mxu0  ;;  %v1344_v33 = vpop.xlane.xlu1 %1343  ;;  %3052 = vrcp.f32 %v1332_v9 }
 0x4cf   : > { %v1793_v63 = vpop.f32.mrb[33].mxu0  ;;  %v1984_v22 = vmul.f32 %v3025_v35, %v2614_v56  ;;  %v1347_v40 = vpop.xlane.xlu0 %1346 }
 0x4d0   : > { %v2615_v26 = vpop.f32.mrb[34].mxu0  ;;  %v1982_v0 = vmul.f32 %v3023_v54, %v1793_v63  ;;  %3054 = vrcp.f32 %v1347_v40 }
 0x4d1   : > { %v1985_v6 = vmul.f32 %v3027_v45, %v2615_v26  ;;  %v1796_v59 = vpop.f32.mrb[35].mxu0 }
 0x4d2   : > { %v1983_v31 = vmul.f32 %v3029_v58, %v1796_v59  ;;  %v1350_v28 = vpop.xlane.xlu1 %1349  ;;  %v3047_v35 = vpop.eup %3046 }
 0x4d3   : > { %v2915_v62 = vpack.i.bf16 %v1985_v6, %v1984_v22  ;;  %v1353_v54 = vpop.xlane.xlu0 %1352  ;;  %v1963_v59 = vmul.f32 %v3047_v35, %v4041_v23 }
 0x4d4   : > { %v2910_v5 = vpack.i.bf16 %v1983_v31, %v1982_v0  ;;  %3056 = vrcp.f32 %v1353_v54 }
 0x4d5   : > { %3058 = vrcp.f32 %v1350_v28 }
 0x4d6   : > { %v3049_v45 = vpop.eup %3048  ;;  %3060 = vrcp.f32 %v1344_v33 }
 0x4d7   : > { %v3051_v21 = vpop.eup %3050 }
 0x4d8   : > { %v3053_v26 = vpop.eup %3052 }
 0x4d9   : > { %v1962_v4 = vmul.f32 %v3053_v26, %v4037_v7 }
 0x4da   : > { %v2622_v42 = vpop.f32.mrb[28].mxu1 }
 0x4db   : > { %v1854_v8 = vpop.f32.mrb[29].mxu1  ;;  %v1988_v14 = vmul.f32 %v3031_v1, %v2622_v42 }
 0x4dc   : > { %v2623_v36 = vpop.f32.mrb[30].mxu1  ;;  %v1986_v44 = vmul.f32 %v3035_v61, %v1854_v8 }
 0x4dd   : > { %v1989_v20 = vmul.f32 %v3033_v30, %v2623_v36  ;;  %v1857_v46 = vpop.f32.mrb[31].mxu1  ;;  %v3055_v36 = vpop.eup %3054 }
 0x4de   : > { %v1987_v18 = vmul.f32 %v3037_v12, %v1857_v46  ;;  %v3057_v7 = vpop.eup %3056  ;;  %v1967_v50 = vmul.f32 %v3055_v36, %v4049_v38 }
 0x4df   : > { %v2900_v11 = vpack.i.bf16 %v1989_v20, %v1988_v14  ;;  %v1969_v55 = vmul.f32 %v3057_v7, %v4047_v32 }
 0x4e0   : > { %v2905_v52 = vpack.i.bf16 %v1987_v18, %v1986_v44 }
 0x4e1   : > { %2901 = vrot.lane.b32.xlu1 %v2900_v11, %s3267_s12 }
 0x4e2   : > { %v2630_v3 = vpop.f32.mrb[36].mxu0  ;;  %2906 = vrot.lane.b32.xlu0 %v2905_v52, %s3267_s12  ;;  %v3059_v52 = vpop.eup %3058 }
 0x4e3   : > { %v1915_v48 = vpop.f32.mrb[37].mxu0  ;;  %v1992_v41 = vmul.f32 %v3043_v51, %v2630_v3  ;;  %v3061_v51 = vpop.eup %3060  ;;  %v1968_v9 = vmul.f32 %v3059_v52, %v4043_v37 }
 0x4e4   : > { %v2631_v43 = vpop.f32.mrb[38].mxu0  ;;  %v1990_v39 = vmul.f32 %v3045_v15, %v1915_v48  ;;  %v1966_v28 = vmul.f32 %v3061_v51, %v4045_v34 }
 0x4e5   : > { %v1993_v57 = vmul.f32 %v3041_v17, %v2631_v43  ;;  %v1918_v27 = vpop.f32.mrb[39].mxu0  ;;  %2916 = vrot.lane.b32.xlu1 %v2915_v62, %s3266_s27  ;;  %v1965_v62 = vmul.f32 %v3049_v45, %v4039_v49 }
 0x4e6   : > { %v1991_v25 = vmul.f32 %v3039_v16, %v1918_v27  ;;  %2911 = vrot.lane.b32.xlu0 %v2910_v5, %s3266_s27  ;;  %v1964_v5 = vmul.f32 %v3051_v21, %v4035_v13 }
 0x4e7   : > { %v2925_v47 = vpack.i.bf16 %v1993_v57, %v1992_v41 }
 0x4e8   : > { %v2920_v19 = vpack.i.bf16 %v1991_v25, %v1990_v39 }
 0x4e9   : > { %2926 = vrot.lane.b32.xlu1 %v2925_v47, %s3267_s12 }
 0x4ea   : > { %2921 = vrot.lane.b32.xlu0 %v2920_v19, %s3267_s12 }
 0x52b   : > { %v2872_v63 = vpop.permute.xlu0 %2871 }
 0x52c   : > { %v2877_v29 = vpop.permute.xlu1 %2876  ;;  %v2874_v58 = vunpack.i.h.bf16 %v2872_v63  ;;  %v2873_v60 = vunpack.i.l.bf16 %v2872_v63 }
 0x52d   : > { %v2879_v22 = vunpack.i.h.bf16 %v2877_v29  ;;  %v2878_v0 = vunpack.i.l.bf16 %v2877_v29 }
 0x52e   : > { %v2093_v30 = vsel %vm607_vm1, %v1965_v62, %v2874_v58  ;;  %v2092_v8 = vsel %vm607_vm1, %v1964_v5, %v2873_v60  ;;  %v2399_v5 = vld [vmem:[%s4166_s3] ss:$0 sm:$0xff] }
 0x52f   : > { %v2091_v61 = vsel %vm607_vm1, %v1963_v59, %v2879_v22  ;;  %v2090_v49 = vsel %vm607_vm1, %v1962_v4, %v2878_v0 }
 0x533   : > { %v4059_v53 = vpop.permute.xlu1 %2881 }
 0x534   : > { %v2887_v31 = vpop.permute.xlu0 %2886  ;;  %v2884_v13 = vunpack.i.h.bf16 %v4059_v53  ;;  %v2883_v43 = vunpack.i.l.bf16 %v4059_v53 }
 0x535   : > { %v2889_v39 = vunpack.i.h.bf16 %v2887_v31  ;;  %v2888_v25 = vunpack.i.l.bf16 %v2887_v31 }
 0x536   : > { %v2097_v53 = vsel %vm607_vm1, %v1969_v55, %v2884_v13  ;;  %v2096_v54 = vsel %vm607_vm1, %v1968_v9, %v2883_v43 }
 0x537   : > { %v2095_v37 = vsel %vm607_vm1, %v1967_v50, %v2889_v39  ;;  %v2094_v32 = vsel %vm607_vm1, %v1966_v28, %v2888_v25 }
 0x53b   : > { %v2892_v56 = vpop.permute.xlu1 %2891 }
 0x53c   : > { %v2894_v2 = vunpack.i.h.bf16 %v2892_v56  ;;  %v2893_v10 = vunpack.i.l.bf16 %v2892_v56 }
 0x53e   : > { %v2102_v46 = vsel %vm2098_vm2, %v2093_v30, %v2894_v2  ;;  %v2101_v44 = vsel %vm2098_vm2, %v2092_v8, %v2893_v10 }
 0x53f   : > { %v2897_v6 = vpop.permute.xlu1 %2896 }
 0x540   : > { %v2899_v1 = vunpack.i.h.bf16 %v2897_v6  ;;  %v2898_v42 = vunpack.i.l.bf16 %v2897_v6 }
 0x542   : > { %v2099_v16 = vsel %vm2098_vm2, %v2090_v49, %v2898_v42  ;;  %v2100_v3 = vsel %vm2098_vm2, %v2091_v61, %v2899_v1 }
 0x553   : > { %v2902_v23 = vpop.permute.xlu1 %2901 }
 0x554   : > { %v2904_v12 = vunpack.i.h.bf16 %v2902_v23  ;;  %v2903_v14 = vunpack.i.l.bf16 %v2902_v23  ;;  %v2907_v20 = vpop.permute.xlu0 %2906 }
 0x555   : > { %v2909_v18 = vunpack.i.h.bf16 %v2907_v20  ;;  %v2908_v11 = vunpack.i.l.bf16 %v2907_v20 }
 0x556   : > { %v2110_v17 = vsel %vm2107_vm3, %v2101_v44, %v2903_v14  ;;  %v2111_v48 = vsel %vm2107_vm3, %v2102_v46, %v2904_v12 }
 0x557   : > { %v2117_v15 = vpack.c.bf16 %v2111_v48, %v2110_v17  ;;  %v2108_v41 = vsel %vm2107_vm3, %v2099_v16, %v2908_v11  ;;  %v2109_v57 = vsel %vm2107_vm3, %v2100_v3, %v2909_v18  ;;  %v2917_v27 = vpop.permute.xlu1 %2916 }
 0x558   : > { %v2116_v47 = vpack.c.bf16 %v2109_v57, %v2108_v41  ;;  %v2912_v19 = vpop.permute.xlu0 %2911  ;;  %v2919_v24 = vunpack.i.h.bf16 %v2917_v27  ;;  %v2918_v33 = vunpack.i.l.bf16 %v2917_v27 }
 0x559   : > { %v2914_v29 = vunpack.i.h.bf16 %v2912_v19  ;;  %v2913_v40 = vunpack.i.l.bf16 %v2912_v19 }
 0x55a   : > { %2636 = vmatprep.mubr.msk.bf16.mxu1 %vm319_vm0, %v2116_v47  ;;  %v2105_v34 = vsel %vm2098_vm2, %v2096_v54, %v2918_v33  ;;  %v2106_v45 = vsel %vm2098_vm2, %v2097_v53, %v2919_v24 }
 0x55b   : > { %v2927_v56 = vpop.permute.xlu1 %2926  ;;  %2637 = vmatmul.mubr.msk.bf16.vlgmr.msra.gmra.mrb[32].mxu1 %vm319_vm0, %v2117_v15  ;;  %v2104_v58 = vsel %vm2098_vm2, %v2095_v37, %v2914_v29  ;;  %v2103_v60 = vsel %vm2098_vm2, %v2094_v32, %v2913_v40 }
 0x55c   : > { %v2929_v35 = vunpack.i.h.bf16 %v2927_v56  ;;  %v2928_v63 = vunpack.i.l.bf16 %v2927_v56  ;;  %v2922_v38 = vpop.permute.xlu0 %2921 }
 0x55d   : > { %v2924_v21 = vunpack.i.h.bf16 %v2922_v38  ;;  %v2923_v26 = vunpack.i.l.bf16 %v2922_v38 }
 0x55e   : > { %v2114_v22 = vsel %vm2107_vm3, %v2105_v34, %v2928_v63  ;;  %v2115_v6 = vsel %vm2107_vm3, %v2106_v45, %v2929_v35 }
 0x55f   : > { %v2119_v59 = vpack.c.bf16 %v2115_v6, %v2114_v22  ;;  %v2113_v0 = vsel %vm2107_vm3, %v2104_v58, %v2924_v21  ;;  %v2112_v31 = vsel %vm2107_vm3, %v2103_v60, %v2923_v26 }
 0x560   : > { %v2118_v62 = vpack.c.bf16 %v2113_v0, %v2112_v31 }
 0x562   : > { %2640 = vmatprep.mubr.msk.bf16.mxu1 %vm319_vm0, %v2118_v62 }
 0x563   : > { %2641 = vmatmul.mubr.msk.bf16.gmra.mrb[36].mxu1 %vm319_vm0, %v2119_v59 }
 0x62e   : > { %v2638_v2 = vpop.f32.mrb[32].mxu1 }
 0x62f   : > { %v2198_v10 = vadd.f32 %v2638_v2, %v2399_v5  ;;  %v2189_v4 = vpop.f32.mrb[33].mxu1 }
 0x630   : > { %v2190_v1 = vadd.f32 %v2399_v5, %v2189_v4  ;;  %v2639_v42 = vpop.f32.mrb[34].mxu1 }
 0x631   : > { %2222 = vst.msk [vmem:[%s287_s30 + $0x10] sm:$0xff] %vm319_vm0, %v2198_v10  ;;  %v2201_v30 = vadd.f32 %v2639_v42, %v2399_v5  ;;  %v2192_v8 = vpop.f32.mrb[35].mxu1 }
 0x632   : > { %2220 = vst.msk [vmem:[%s287_s30] sm:$0xff] %vm319_vm0, %v2190_v1  ;;  %v2193_v61 = vadd.f32 %v2399_v5, %v2192_v8 }
 0x633   : > { %2223 = vst.msk [vmem:[%s287_s30 + $0x18] sm:$0xff] %vm319_vm0, %v2201_v30 }
 0x634   : > { %2221 = vst.msk [vmem:[%s287_s30 + $0x8] sm:$0xff] %vm319_vm0, %v2193_v61 }
 0x636   : > { %v2642_v23 = vpop.f32.mrb[36].mxu1 }
 0x637   : > { %v2214_v36 = vadd.f32 %v2642_v23, %v2399_v5  ;;  %v2205_v49 = vpop.f32.mrb[37].mxu1 }
 0x638   : > { %v2206_v13 = vadd.f32 %v2399_v5, %v2205_v49  ;;  %v2643_v12 = vpop.f32.mrb[38].mxu1 }
 0x639   : > { %2226 = vst.msk [vmem:[%s287_s30 + $0x30] sm:$0xff] %vm319_vm0, %v2214_v36  ;;  %v2217_v14 = vadd.f32 %v2643_v12, %v2399_v5  ;;  %v2208_v20 = vpop.f32.mrb[39].mxu1 }
 0x63a   : > { %2224 = vst.msk [vmem:[%s287_s30 + $0x20] sm:$0xff] %vm319_vm0, %v2206_v13  ;;  %v2209_v7 = vadd.f32 %v2399_v5, %v2208_v20 }
 0x63b   : > { %2227 = vst.msk [vmem:[%s287_s30 + $0x38] sm:$0xff] %vm319_vm0, %v2217_v14 }
 0x63c   : > { %2225 = vst.msk [vmem:[%s287_s30 + $0x28] sm:$0xff] %vm319_vm0, %v2209_v7 }
 0x63d   : > { %3189 = shalt.err (!%p3186_p4)
}
 0x63e   : > { %s3190_s27 = scalar_lea.hbm %s4113_s24, 1024  ;;  %s3194_s15 = scalar_lea.hbm %s4168_s5, 2048 }
 0x63f   : > { %p3191_p9 = scmp.ne.s32.totalorder %s4113_s24, %s3190_s27  ;;  %p3195_p8 = scmp.lt.u32.totalorder %s4113_s24, %s4168_s5 }
 0x640   : > { %p3196_p13 = scmp.lt.u32.totalorder %s3194_s15, %s3190_s27  ;;  %p3198_p10 = scmp.lt.u32.totalorder %s3190_s27, %s4113_s24 }
 0x641   : > { %p3192_p0 = pnand %p3191_p9, %p3448_p5 }
 0x642   : > { %p3197_p6 = por %p3196_p13, %p3195_p8 }
 0x643   : > { %p3193_p11 = pneg %p3192_p0 }
 0x644   : > { %p3199_p3 = por %p3198_p10, %p3197_p6 }
 0x646   : > { %p3200_p7 = pnand %p3199_p3, %p3193_p11 }
 0x648   : > { %3203 = shalt.err (!%p3200_p7)
}
 0x649   : > { %s3269_s8 = smov 128  }
 0x64a   : > { %2674 = dma.vmem_to_hbm [thread:$0]  (%p3448_p5), %s4116_s11, 1024, %s4113_s24, %s2229_s22, %s3269_s8, %s3269_s8, %s3265_s16  }
 0x64b PF: > { %s2258_s23 = sand.u32 1, %s3238_s18   ;;  %p4186_p12 = scmp.ne.s32.totalorder %s4173_s25, 0 }
 0x64c   : > { %p4187_p2 = scmp.ge.s32.totalorder %s3250_s21, 2  ;;  %s2259_s26 = scalar_lea.sflag [#allocation4], %s2258_s23 }
 0x64e   : > { %p2691_p1 = pnand %p4187_p2, %p4186_p12 }
 0x650   : > { %3233 = dma.done.wait (!%p2691_p1), %s2259_s26, 1024  }
 0x651   : > { %3235 = vsyncadd (!%p2691_p1), %s2259_s26, 4294966272  ;;  %p20_p4 = scmp.ge.s32.totalorder %s3434_s28, 4   ;;  %s4188_s18 = smov %s3242_s19 }
 0x652   : > { %s4189_s19 = smov %s3246_s20  ;;  %s4190_s20 = smov %s3444_s7 }
 0x653   : > { %s4191_s21 = smov %s3434_s28  ;;  %22 = sbr.rel (!%p20_p4) target bundleno = 7 (0x7), region = 97 }
 0x65a   :  { %2264 = vsyncpa [#allocation3], 1 }
 0x65b   :  { %2266 = vsyncpa [#allocation3 + $0x1], 1 }
 0x65c   :  { %2267 = vsyncpa [#allocation6], 1 }
 0x65d   :  { %2268 = vsyncpa [#allocation9], 1 }
 0x65e   :  { %2269 = vsyncpa [#allocation4], 1 }
 0x65f   :  { %2271 = vsyncpa [#allocation4 + $0x1], 1 }

</bundles_post_ra>
